<compile_context>
chip_gen: v6e
topology: v6e:2x2x1
jax: 0.10.0
libtpu: 0.0.40
codegen_flags: <defaults>
</compile_context>

<pallas_src>
import jax
import jax.numpy as jnp
from jax.experimental import pallas as pl
from jax.experimental.pallas import tpu as pltpu


def fc_decoder_kernel(z_ref, w3_ref, b3_ref, w4_ref, b4_ref, out_ref):
    # fc3: (bm, E) bf16 @ (E, H) bf16 -> f32 accumulation on the MXU.
    # K=32 under-fills the MXU contraction dim, but fc4 (K=1024) carries ~96% of
    # the FLOPs, so this is left as a single matmul.
    h3 = jnp.dot(z_ref[...], w3_ref[...], preferred_element_type=jnp.float32)
    h3 = jnp.maximum(h3 + b3_ref[...], 0.0)          # bias + ReLU in f32 (VPU)

    # fc4: cast the activation to bf16 for the MXU, accumulate in f32.
    logits = jnp.dot(h3.astype(jnp.bfloat16), w4_ref[...],
                     preferred_element_type=jnp.float32)
    logits = logits + b4_ref[...]                    # bias in f32
    out_ref[...] = jax.nn.sigmoid(logits).astype(out_ref.dtype)   # EUP sigmoid, f32


def fc_decoder(z, w3, b3, w4, b4, *, bm=None):
    """y = sigmoid(relu(z @ w3 + b3) @ w4 + b4), computed in a Pallas TPU kernel.

    z:  (B, E) float32
    w3: (E, H) float32, b3: (1, H) float32
    w4: (H, O) float32, b4: (1, O) float32
    """
    B, E = z.shape
    H = w3.shape[1]      # 1024
    O = w4.shape[1]      # 784

    # Batch tile: fill the MXU M dimension (256 on v6e/v7x; 2 passes on v5e's
    # 128-tall MXU), but never exceed the batch itself.
    if bm is None:
        bm = min(B, 256)
    bm = max(1, min(bm, B))

    # Pad the batch up to a multiple of bm so the grid tiles evenly (ragged B).
    Bp = ((B + bm - 1) // bm) * bm
    z_p = jnp.pad(z, ((0, Bp - B), (0, 0))) if Bp != B else z

    # Cast matmul operands to bf16; biases stay f32 for the epilogue.
    z_bf = z_p.astype(jnp.bfloat16)
    w3_bf = w3.astype(jnp.bfloat16)
    w4_bf = w4.astype(jnp.bfloat16)
    b3_f = b3.reshape(1, H).astype(jnp.float32)
    b4_f = b4.reshape(1, O).astype(jnp.float32)

    grid = (Bp // bm,)

    out = pl.pallas_call(
        fc_decoder_kernel,
        out_shape=jax.ShapeDtypeStruct((Bp, O), jnp.float32),
        grid_spec=pltpu.PrefetchScalarGridSpec(
            num_scalar_prefetch=0,
            grid=grid,
            in_specs=[
                pl.BlockSpec((bm, E), lambda i: (i, 0)),   # z tile per batch block
                pl.BlockSpec((E, H), lambda i: (0, 0)),    # full fc3 weight (bf16)
                pl.BlockSpec((1, H), lambda i: (0, 0)),    # fc3 bias (f32)
                pl.BlockSpec((H, O), lambda i: (0, 0)),    # full fc4 weight (bf16)
                pl.BlockSpec((1, O), lambda i: (0, 0)),    # fc4 bias (f32)
            ],
            out_specs=pl.BlockSpec((bm, O), lambda i: (i, 0)),
        ),
        compiler_params=pltpu.CompilerParams(
            # Batch-tile axis is independent -> shards across TCs on v7x when
            # the grid has >= 2 steps.
            dimension_semantics=("parallel",),
        ),
    )(z_bf, w3_bf, b3_f, w4_bf, b4_f)

    return out[:B] if Bp != B else out


def fc_decoder_ref(z, w3, b3, w4, b4):
    # Full-f32 reference (matches the PyTorch module's math).
    h3 = jnp.maximum(z @ w3 + b3, 0.0)
    return jax.nn.sigmoid(h3 @ w4 + b4)


if __name__ == "__main__":
    EMBEDDING_SIZE = 32
    HIDDEN = 1024
    OUT = 784

    key = jax.random.PRNGKey(0)
    kz, k3w, k3b, k4w, k4b, kz2 = jax.random.split(key, 6)

    # Deterministic synthetic parameters (PyTorch nn.Linear-like uniform init).
    lim3 = 1.0 / jnp.sqrt(EMBEDDING_SIZE)
    w3 = jax.random.uniform(k3w, (EMBEDDING_SIZE, HIDDEN), jnp.float32, -lim3, lim3)
    b3 = jax.random.uniform(k3b, (1, HIDDEN), jnp.float32, -lim3, lim3)
    lim4 = 1.0 / jnp.sqrt(HIDDEN)
    w4 = jax.random.uniform(k4w, (HIDDEN, OUT), jnp.float32, -lim4, lim4)
    b4 = jax.random.uniform(k4b, (1, OUT), jnp.float32, -lim4, lim4)

    # --- small-batch check (single grid step, bm == B) ---
    B_small = 8
    z_small = jax.random.normal(kz, (B_small, EMBEDDING_SIZE), dtype=jnp.float32)
    out_small = jax.block_until_ready(fc_decoder(z_small, w3, b3, w4, b4))
    ref_small = fc_decoder_ref(z_small, w3, b3, w4, b4)
    assert out_small.shape == (B_small, OUT)
    # bf16 matmul operands with f32 accumulation -> loosened tolerance vs f32 ref.
    assert jnp.allclose(out_small, ref_small, atol=2e-2, rtol=0.0)

    # --- larger-batch check: exercises the tiled path (bm=256, grid=2) ---
    B_big = 512
    z_big = jax.random.normal(kz2, (B_big, EMBEDDING_SIZE), dtype=jnp.float32)
    out_big = jax.block_until_ready(fc_decoder(z_big, w3, b3, w4, b4))
    ref_big = fc_decoder_ref(z_big, w3, b3, w4, b4)
    assert out_big.shape == (B_big, OUT)
    assert jnp.allclose(out_big, ref_big, atol=2e-2, rtol=0.0)

    print("KERNEL_OK")
</pallas_src>

<mosaic_0001>
module attributes {stable_mosaic.version = 11 : i64} {
  func.func @fc_decoder_kernel(%arg0: i32, %arg1: memref<8x32xbf16, #tpu.memory_space<vmem>>, %arg2: memref<32x1024xbf16, #tpu.memory_space<vmem>>, %arg3: memref<1x1024xf32, #tpu.memory_space<vmem>>, %arg4: memref<1024x784xbf16, #tpu.memory_space<vmem>>, %arg5: memref<1x784xf32, #tpu.memory_space<vmem>>, %arg6: memref<8x784xf32, #tpu.memory_space<vmem>>) attributes {dimension_semantics = [#tpu.dimension_semantics<parallel>], iteration_bounds = array<i64: 1>, scalar_prefetch = 0 : i64, scratch_operands = 0 : i64, tpu.core_type = #tpu.core_type<tc>, window_params = [{transform_indices = @transform_0, window_bounds = array<i64: 8, 32>}, {pipeline_mode = #tpu.pipeline_mode<synchronous>, transform_indices = @transform_1, window_bounds = array<i64: 32, 1024>}, {pipeline_mode = #tpu.pipeline_mode<synchronous>, transform_indices = @transform_2, window_bounds = array<i64: 1, 1024>}, {pipeline_mode = #tpu.pipeline_mode<synchronous>, transform_indices = @transform_3, window_bounds = array<i64: 1024, 784>}, {pipeline_mode = #tpu.pipeline_mode<synchronous>, transform_indices = @transform_4, window_bounds = array<i64: 1, 784>}, {transform_indices = @transform_5, window_bounds = array<i64: 8, 784>}]} {
    %c0 = arith.constant 0 : index
    %c0_0 = arith.constant 0 : index
    %0 = vector.load %arg1[%c0, %c0_0] : memref<8x32xbf16, #tpu.memory_space<vmem>>, vector<8x32xbf16>
    %c0_1 = arith.constant 0 : index
    %c0_2 = arith.constant 0 : index
    %1 = vector.load %arg2[%c0_1, %c0_2] : memref<32x1024xbf16, #tpu.memory_space<vmem>>, vector<32x1024xbf16>
    %cst = arith.constant dense<0.000000e+00> : vector<8x1024xf32>
    %2 = tpu.matmul %0, %1, %cst {dimension_numbers = #tpu.dot_dimension_numbers<[1], [0], [0], [1], [0, 0, 1, 1], [], []>} : vector<8x32xbf16>, vector<32x1024xbf16>, vector<8x1024xf32> -> vector<8x1024xf32>
    %c0_3 = arith.constant 0 : index
    %c0_4 = arith.constant 0 : index
    %3 = vector.load %arg3[%c0_3, %c0_4] : memref<1x1024xf32, #tpu.memory_space<vmem>>, vector<1x1024xf32>
    %4 = vector.broadcast %3 : vector<1x1024xf32> to vector<8x1024xf32>
    %5 = arith.addf %2, %4 : vector<8x1024xf32>
    %cst_5 = arith.constant 0.000000e+00 : f32
    %6 = vector.broadcast %cst_5 : f32 to vector<8x1024xf32>
    %7 = arith.maximumf %5, %6 : vector<8x1024xf32>
    %8 = arith.truncf %7 : vector<8x1024xf32> to vector<8x1024xbf16>
    %c0_6 = arith.constant 0 : index
    %c0_7 = arith.constant 0 : index
    %9 = vector.load %arg4[%c0_6, %c0_7] : memref<1024x784xbf16, #tpu.memory_space<vmem>>, vector<1024x784xbf16>
    %cst_8 = arith.constant dense<0.000000e+00> : vector<8x784xf32>
    %10 = tpu.matmul %8, %9, %cst_8 {dimension_numbers = #tpu.dot_dimension_numbers<[1], [0], [0], [1], [0, 0, 1, 1], [], []>} : vector<8x1024xbf16>, vector<1024x784xbf16>, vector<8x784xf32> -> vector<8x784xf32>
    %c0_9 = arith.constant 0 : index
    %c0_10 = arith.constant 0 : index
    %11 = vector.load %arg5[%c0_9, %c0_10] : memref<1x784xf32, #tpu.memory_space<vmem>>, vector<1x784xf32>
    %12 = vector.broadcast %11 : vector<1x784xf32> to vector<8x784xf32>
    %13 = arith.addf %10, %12 : vector<8x784xf32>
    %14 = arith.negf %13 : vector<8x784xf32>
    %15 = math.exp %14 : vector<8x784xf32>
    %cst_11 = arith.constant 1.000000e+00 : f32
    %16 = vector.broadcast %cst_11 : f32 to vector<8x784xf32>
    %17 = arith.addf %16, %15 : vector<8x784xf32>
    %18 = arith.divf %16, %17 : vector<8x784xf32>
    %c0_12 = arith.constant 0 : index
    %c0_13 = arith.constant 0 : index
    %19 = vector.load %arg6[%c0_12, %c0_13] : memref<8x784xf32, #tpu.memory_space<vmem>>, vector<8x784xf32>
    tpu.vector_store %arg6[%c0_12, %c0_13], %18 {strides = array<i32>} : memref<8x784xf32, #tpu.memory_space<vmem>>, vector<8x784xf32>,
    return
  }
  func.func @transform_0(%arg0: i32) -> (i32, i32) {
    %c0_i32 = arith.constant 0 : i32
    %c0_i32_0 = arith.constant 0 : i32
    return %arg0, %c0_i32 : i32, i32
  }
  func.func @transform_1(%arg0: i32) -> (i32, i32) {
    %c0_i32 = arith.constant 0 : i32
    %c0_i32_0 = arith.constant 0 : i32
    %c0_i32_1 = arith.constant 0 : i32
    return %c0_i32, %c0_i32_0 : i32, i32
  }
  func.func @transform_2(%arg0: i32) -> (i32, i32) {
    %c0_i32 = arith.constant 0 : i32
    %c0_i32_0 = arith.constant 0 : i32
    %c0_i32_1 = arith.constant 0 : i32
    return %c0_i32, %c0_i32_0 : i32, i32
  }
  func.func @transform_3(%arg0: i32) -> (i32, i32) {
    %c0_i32 = arith.constant 0 : i32
    %c0_i32_0 = arith.constant 0 : i32
    %c0_i32_1 = arith.constant 0 : i32
    return %c0_i32, %c0_i32_0 : i32, i32
  }
  func.func @transform_4(%arg0: i32) -> (i32, i32) {
    %c0_i32 = arith.constant 0 : i32
    %c0_i32_0 = arith.constant 0 : i32
    %c0_i32_1 = arith.constant 0 : i32
    return %c0_i32, %c0_i32_0 : i32, i32
  }
  func.func @transform_5(%arg0: i32) -> (i32, i32) {
    %c0_i32 = arith.constant 0 : i32
    %c0_i32_0 = arith.constant 0 : i32
    return %arg0, %c0_i32 : i32, i32
  }
}

</mosaic_0001>

<bundles_post_ra>
// kernel: tpu_custom_call.1
= control target key start
LH: loop header
LB: loop body
LE: loop exit
PB: predicated region body
PF: predicated region fallthrough
CT: control target
= control target key end

     0   :  { %v5169_v8 = vmov 0   ;;  %vm161_vm0 = vcmask 261120   ;;  %s6744_s0 = inlined_call_operand.vmem [shape: bf16[8,32], index: 0, kind: input, shape index: {}]   ;;  %s6745_s1 = inlined_call_operand.vmem [shape: bf16[32,1024], index: 1, kind: input, shape index: {}]   ;;  %s6746_s2 = inlined_call_operand.vmem [shape: f32[1,1024], index: 2, kind: input, shape index: {}]   ;;  %s6747_s3 = inlined_call_operand.vmem [shape: bf16[1024,784], index: 3, kind: input, shape index: {}]   ;;  %s6748_s4 = inlined_call_operand.vmem [shape: f32[1,784], index: 4, kind: input, shape index: {}]   ;;  %s6749_s5 = inlined_call_operand.hbm [shape: f32[8,784], index: 5, kind: output, shape index: {}]  }
   0x1   :  { %v31_v0 = vld [vmem:[%s6745_s1 + $0x40] sm:$0xff]  ;;  %v32_v2 = vld [vmem:[%s6745_s1 + $0x48] sm:$0xff]  ;;  %197 = vmatprep.mubr.bf16.mxu0 %v5169_v8  ;;  %238 = vmatprep.mubr.bf16.mxu1 %v5169_v8  ;;  %v33_v15 = vld [vmem:[%s6745_s1 + $0x50] sm:$0xff] }
   0x2   :  { %v35_v1 = vld [vmem:[%s6745_s1 + $0x60] sm:$0xff]  ;;  %v36_v4 = vld [vmem:[%s6745_s1 + $0x68] sm:$0xff]  ;;  %v37_v16 = vld [vmem:[%s6745_s1 + $0x70] sm:$0xff] }
   0x3   :  { %v3923_v3 = vcombine.high %v31_v0, %v35_v1  ;;  %v3922_v5 = vcombine.low %v31_v0, %v35_v1  ;;  %v23_v6 = vld [vmem:[%s6745_s1] sm:$0xff]  ;;  %v3925_v9 = vcombine.high %v32_v2, %v36_v4  ;;  %v3924_v10 = vcombine.low %v32_v2, %v36_v4  ;;  %v24_v12 = vld [vmem:[%s6745_s1 + $0x8] sm:$0xff]  ;;  %v34_v17 = vld [vmem:[%s6745_s1 + $0x58] sm:$0xff] }
   0x4   :  { %v27_v7 = vld [vmem:[%s6745_s1 + $0x20] sm:$0xff]  ;;  %v28_v13 = vld [vmem:[%s6745_s1 + $0x28] sm:$0xff]  ;;  %v38_v19 = vld [vmem:[%s6745_s1 + $0x78] sm:$0xff]  ;;  %v3927_v21 = vcombine.high %v33_v15, %v37_v16  ;;  %v3926_v28 = vcombine.low %v33_v15, %v37_v16 }
   0x5   :  { %v3915_v11 = vcombine.high %v23_v6, %v27_v7  ;;  %177 = vmatprep.subr.bf16.mxu0 %v3923_v3  ;;  %v3917_v14 = vcombine.high %v24_v12, %v28_v13  ;;  %218 = vmatprep.subr.bf16.mxu1 %v3925_v9  ;;  %v3914_v18 = vcombine.low %v23_v6, %v27_v7  ;;  %v25_v22 = vld [vmem:[%s6745_s1 + $0x10] sm:$0xff]  ;;  %v26_v25 = vld [vmem:[%s6745_s1 + $0x18] sm:$0xff]  ;;  %v22_v27 = vld [vmem:[%s6744_s0] sm:$0xf] }
   0x6   :  { %178 = vmatpush1.bf16.msra.mxu0 %v3922_v5  ;;  %219 = vmatpush1.bf16.msra.mxu1 %v3924_v10  ;;  %v3916_v20 = vcombine.low %v24_v12, %v28_v13  ;;  %v3929_v23 = vcombine.high %v34_v17, %v38_v19  ;;  %v29_v24 = vld [vmem:[%s6745_s1 + $0x30] sm:$0xff]  ;;  %v30_v26 = vld [vmem:[%s6745_s1 + $0x38] sm:$0xff]  ;;  %v3928_v29 = vcombine.low %v34_v17, %v38_v19  ;;  %v4481_v34 = vld [vmem:[%s6747_s3 + $0x18c] ss:$28 sps:$4 sm:$0xff]  }
   0x7   :  { %179 = vmatprep.subr.bf16.mxu0 %v3915_v11  ;;  %220 = vmatprep.subr.bf16.mxu1 %v3917_v14  ;;  %v3919_v30 = vcombine.high %v25_v22, %v29_v24  ;;  %v3921_v31 = vcombine.high %v26_v25, %v30_v26  ;;  %v3918_v32 = vcombine.low %v25_v22, %v29_v24  ;;  %v4484_v35 = vld [vmem:[%s6747_s3 + $0x50c] ss:$28 sps:$4 sm:$0xff]   ;;  %v4487_v38 = vld [vmem:[%s6747_s3 + $0x154] ss:$28 sps:$4 sm:$0xff]   ;;  %v4493_v42 = vld [vmem:[%s6747_s3 + $0x11c] ss:$28 sps:$4 sm:$0xff]  }
   0x8   :  { %v3920_v33 = vcombine.low %v26_v25, %v30_v26  ;;  %v4479_v36 = vld [vmem:[%s6747_s3 + $0x188] ss:$28 sps:$4 sm:$0xff]   ;;  %v4490_v39 = vld [vmem:[%s6747_s3 + $0x4d4] ss:$28 sps:$4 sm:$0xff]   ;;  %v4496_v43 = vld [vmem:[%s6747_s3 + $0x49c] ss:$28 sps:$4 sm:$0xff]  }
   0x9   :  { %v4482_v37 = vld [vmem:[%s6747_s3 + $0x508] ss:$28 sps:$4 sm:$0xff]   ;;  %v4485_v40 = vld [vmem:[%s6747_s3 + $0x150] ss:$28 sps:$4 sm:$0xff]   ;;  %v4491_v44 = vld [vmem:[%s6747_s3 + $0x118] ss:$28 sps:$4 sm:$0xff]  }
   0xa   :  { %180 = vmatpush1.bf16.msra.mxu0 %v3914_v18  ;;  %221 = vmatpush1.bf16.msra.mxu1 %v3916_v20  ;;  %v4488_v41 = vld [vmem:[%s6747_s3 + $0x4d0] ss:$28 sps:$4 sm:$0xff]   ;;  %v4494_v45 = vld [vmem:[%s6747_s3 + $0x498] ss:$28 sps:$4 sm:$0xff]   ;;  %v4499_v46 = vld [vmem:[%s6747_s3 + $0xe4] ss:$28 sps:$4 sm:$0xff]  }
   0xb   :  { %259 = vmatprep.subr.bf16.mxu0 %v3927_v21  ;;  %300 = vmatprep.subr.bf16.mxu1 %v3929_v23  ;;  %v4502_v47 = vld [vmem:[%s6747_s3 + $0x464] ss:$28 sps:$4 sm:$0xff]   ;;  %v4505_v50 = vld [vmem:[%s6747_s3 + $0xac] ss:$28 sps:$4 sm:$0xff]   ;;  %v4511_v54 = vld [vmem:[%s6747_s3 + $0x74] ss:$28 sps:$4 sm:$0xff]  }
   0xc   :  { %v4497_v48 = vld [vmem:[%s6747_s3 + $0xe0] ss:$28 sps:$4 sm:$0xff]   ;;  %v4508_v51 = vld [vmem:[%s6747_s3 + $0x42c] ss:$28 sps:$4 sm:$0xff]   ;;  %v4514_v55 = vld [vmem:[%s6747_s3 + $0x3f4] ss:$28 sps:$4 sm:$0xff]  }
   0xd   :  { %3930 = vmatmul.mubr.msk.bf16.vlgmr.msra.gmra.mxu0 %vm161_vm0, %v22_v27  ;;  %3931 = vmatmul.mubr.msk.bf16.vlgmr.msra.gmra.mxu1 %vm161_vm0, %v22_v27  ;;  %v4500_v49 = vld [vmem:[%s6747_s3 + $0x460] ss:$28 sps:$4 sm:$0xff]   ;;  %v4503_v52 = vld [vmem:[%s6747_s3 + $0xa8] ss:$28 sps:$4 sm:$0xff]   ;;  %v4509_v56 = vld [vmem:[%s6747_s3 + $0x70] ss:$28 sps:$4 sm:$0xff]  }
   0xe   :  { %260 = vmatpush1.bf16.msra.mxu0 %v3926_v28  ;;  %301 = vmatpush1.bf16.msra.mxu1 %v3928_v29  ;;  %v4506_v53 = vld [vmem:[%s6747_s3 + $0x428] ss:$28 sps:$4 sm:$0xff]   ;;  %v4512_v57 = vld [vmem:[%s6747_s3 + $0x3f0] ss:$28 sps:$4 sm:$0xff]   ;;  %v4517_v58 = vld [vmem:[%s6747_s3 + $0x3c] ss:$28 sps:$4 sm:$0xff]  }
   0xf   :  { %261 = vmatprep.subr.bf16.mxu0 %v3919_v30  ;;  %302 = vmatprep.subr.bf16.mxu1 %v3921_v31  ;;  %v4520_v59 = vld [vmem:[%s6747_s3 + $0x3bc] ss:$28 sps:$4 sm:$0xff]   ;;  %v4523_v62 = vld [vmem:[%s6747_s3 + $0x4] ss:$28 sps:$4 sm:$0xff]   ;;  %v4529_v2 = vld [vmem:[%s6747_s3 + $0x34c] ss:$28 sps:$4 sm:$0xff]  }
  0x10   :  { %279 = vmatprep.mubr.bf16.mxu0 %v5169_v8  ;;  %320 = vmatprep.mubr.bf16.mxu1 %v5169_v8  ;;  %v4515_v60 = vld [vmem:[%s6747_s3 + $0x38] ss:$28 sps:$4 sm:$0xff]   ;;  %v4521_v63 = vld [vmem:[%s6747_s3] ss:$28 sps:$4 sm:$0xff]   ;;  %v4532_v3 = vld [vmem:[%s6747_s3 + $0x6cc] ss:$28 sps:$4 sm:$0xff]  }
  0x11   :  { %v4518_v61 = vld [vmem:[%s6747_s3 + $0x3b8] ss:$28 sps:$4 sm:$0xff]   ;;  %v4526_v0 = vld [vmem:[%s6747_s3 + $0x384] ss:$28 sps:$4 sm:$0xff]   ;;  %v4533_v8 = vld [vmem:[%s6747_s3 + $0x310] ss:$28 sps:$4 sm:$0xff]  }
  0x12   :  { %262 = vmatpush1.bf16.msra.mxu0 %v3918_v32  ;;  %303 = vmatpush1.bf16.msra.mxu1 %v3920_v33  ;;  %v4524_v1 = vld [vmem:[%s6747_s3 + $0x380] ss:$28 sps:$4 sm:$0xff]   ;;  %v4527_v4 = vld [vmem:[%s6747_s3 + $0x348] ss:$28 sps:$4 sm:$0xff]   ;;  %v4535_v6 = vld [vmem:[%s6747_s3 + $0x314] ss:$28 sps:$4 sm:$0xff]  }
  0x13   :  { %3198 = vmatprep.subr.bf16.mxu0 %v4481_v34  ;;  %3239 = vmatprep.subr.bf16.mxu1 %v4484_v35  ;;  %v4530_v5 = vld [vmem:[%s6747_s3 + $0x6c8] ss:$28 sps:$4 sm:$0xff]   ;;  %v4538_v7 = vld [vmem:[%s6747_s3 + $0x694] ss:$28 sps:$4 sm:$0xff]   ;;  %v4541_v10 = vld [vmem:[%s6747_s3 + $0x2dc] ss:$28 sps:$4 sm:$0xff]  }
  0x14   :  { %v4536_v9 = vld [vmem:[%s6747_s3 + $0x690] ss:$28 sps:$4 sm:$0xff]   ;;  %v4544_v11 = vld [vmem:[%s6747_s3 + $0x65c] ss:$28 sps:$4 sm:$0xff]   ;;  %v4547_v14 = vld [vmem:[%s6747_s3 + $0x2a4] ss:$28 sps:$4 sm:$0xff]  }
  0x15   :  { %3932 = vmatmul.mubr.msk.bf16.vlgmr.msra.gmra.mxu0 %vm161_vm0, %v22_v27  ;;  %3933 = vmatmul.mubr.msk.bf16.vlgmr.msra.gmra.mxu1 %vm161_vm0, %v22_v27  ;;  %v4539_v12 = vld [vmem:[%s6747_s3 + $0x2d8] ss:$28 sps:$4 sm:$0xff]   ;;  %v4550_v15 = vld [vmem:[%s6747_s3 + $0x624] ss:$28 sps:$4 sm:$0xff]   ;;  %v4553_v18 = vld [vmem:[%s6747_s3 + $0x26c] ss:$28 sps:$4 sm:$0xff]  }
  0x16   :  { %3199 = vmatpush1.bf16.msra.mxu0 %v4479_v36  ;;  %3240 = vmatpush1.bf16.msra.mxu1 %v4482_v37  ;;  %v4542_v13 = vld [vmem:[%s6747_s3 + $0x658] ss:$28 sps:$4 sm:$0xff]   ;;  %v4545_v16 = vld [vmem:[%s6747_s3 + $0x2a0] ss:$28 sps:$4 sm:$0xff]   ;;  %v4556_v19 = vld [vmem:[%s6747_s3 + $0x5ec] ss:$28 sps:$4 sm:$0xff]   ;;  %v41_v36 = vlaneseq }
  0x17   :  { %3200 = vmatprep.subr.bf16.mxu0 %v4487_v38  ;;  %3241 = vmatprep.subr.bf16.mxu1 %v4490_v39  ;;  %v4548_v17 = vld [vmem:[%s6747_s3 + $0x620] ss:$28 sps:$4 sm:$0xff]   ;;  %v4551_v20 = vld [vmem:[%s6747_s3 + $0x268] ss:$28 sps:$4 sm:$0xff]   ;;  %v4559_v22 = vld [vmem:[%s6747_s3 + $0x234] ss:$28 sps:$4 sm:$0xff]  }
  0x18   :  { %v4554_v21 = vld [vmem:[%s6747_s3 + $0x5e8] ss:$28 sps:$4 sm:$0xff]   ;;  %v4562_v23 = vld [vmem:[%s6747_s3 + $0x5b4] ss:$28 sps:$4 sm:$0xff]   ;;  %v4565_v26 = vld [vmem:[%s6747_s3 + $0x1fc] ss:$28 sps:$4 sm:$0xff]  }
  0x19   :  { %v4557_v24 = vld [vmem:[%s6747_s3 + $0x230] ss:$28 sps:$4 sm:$0xff]   ;;  %v4568_v27 = vld [vmem:[%s6747_s3 + $0x57c] ss:$28 sps:$4 sm:$0xff]   ;;  %v4571_v30 = vld [vmem:[%s6747_s3 + $0x1c4] ss:$28 sps:$4 sm:$0xff]  }
  0x1a   :  { %3201 = vmatpush1.bf16.msra.mxu0 %v4485_v40  ;;  %3242 = vmatpush1.bf16.msra.mxu1 %v4488_v41  ;;  %v4560_v25 = vld [vmem:[%s6747_s3 + $0x5b0] ss:$28 sps:$4 sm:$0xff]   ;;  %v4563_v28 = vld [vmem:[%s6747_s3 + $0x1f8] ss:$28 sps:$4 sm:$0xff]   ;;  %v4574_v31 = vld [vmem:[%s6747_s3 + $0x544] ss:$28 sps:$4 sm:$0xff]  }
  0x1b   :  { %3202 = vmatprep.subr.bf16.mxu0 %v4493_v42  ;;  %3243 = vmatprep.subr.bf16.mxu1 %v4496_v43  ;;  %v4566_v29 = vld [vmem:[%s6747_s3 + $0x578] ss:$28 sps:$4 sm:$0xff]   ;;  %v4569_v32 = vld [vmem:[%s6747_s3 + $0x1c0] ss:$28 sps:$4 sm:$0xff]   ;;  %v4577_v34 = vld [vmem:[%s6747_s3 + $0x88c] ss:$28 sps:$4 sm:$0xff]  }
  0x1c   :  { %v4572_v33 = vld [vmem:[%s6747_s3 + $0x540] ss:$28 sps:$4 sm:$0xff]   ;;  %v4580_v35 = vld [vmem:[%s6747_s3 + $0xc0c] ss:$28 sps:$4 sm:$0xff]   ;;  %v5454_v37 = vshrl.u32 %v41_v36, 7 }
  0x1d   :  { %v5459_v38 = vld [vmem:[%s6746_s2] sm:$0xff] }
  0x1e   :  { %3203 = vmatpush1.bf16.msra.mxu0 %v4491_v44  ;;  %3244 = vmatpush1.bf16.msra.mxu1 %v4494_v45  ;;  %v43_v39 = vsub.s32 0, %v5454_v37  ;;  %v51_v40 = vsub.s32 2, %v5454_v37  ;;  %v47_v41 = vsub.s32 1, %v5454_v37  ;;  %v55_v42 = vsub.s32 3, %v5454_v37  ;;  %v4599_v36 = vld [vmem:[%s6747_s3 + $0x7a8] ss:$28 sps:$4 sm:$0xff]  }
  0x1f   :  { %3204 = vmatprep.subr.bf16.mxu0 %v4499_v46  ;;  %3245 = vmatprep.subr.bf16.mxu1 %v4502_v47 }
  0x20   :  { %v44_v43 = vrot.slane %v5459_v38, %v43_v39  ;;  %v52_v44 = vrot.slane %v5459_v38, %v51_v40  ;;  %v48_v45 = vrot.slane %v5459_v38, %v47_v41  ;;  %v56_v47 = vrot.slane %v5459_v38, %v55_v42 }
  0x22   :  { %3205 = vmatpush1.bf16.msra.mxu0 %v4497_v48  ;;  %3246 = vmatpush1.bf16.msra.mxu1 %v4500_v49 }
  0x23   :  { %3206 = vmatprep.subr.bf16.mxu0 %v4505_v50  ;;  %3247 = vmatprep.subr.bf16.mxu1 %v4508_v51 }
  0x26   :  { %3207 = vmatpush1.bf16.msra.mxu0 %v4503_v52  ;;  %3248 = vmatpush1.bf16.msra.mxu1 %v4506_v53 }
  0x27   :  { %3208 = vmatprep.subr.bf16.mxu0 %v4511_v54  ;;  %3249 = vmatprep.subr.bf16.mxu1 %v4514_v55  ;;  %v63_v54 = vsub.s32 5, %v5454_v37 }
  0x2a   :  { %3209 = vmatpush1.bf16.msra.mxu0 %v4509_v56  ;;  %3250 = vmatpush1.bf16.msra.mxu1 %v4512_v57 }
  0x2b   :  { %3210 = vmatprep.subr.bf16.mxu0 %v4517_v58  ;;  %3251 = vmatprep.subr.bf16.mxu1 %v4520_v59  ;;  %v71_v59 = vsub.s32 7, %v5454_v37 }
  0x2e   :  { %3211 = vmatpush1.bf16.msra.mxu0 %v4515_v60  ;;  %3252 = vmatpush1.bf16.msra.mxu1 %v4518_v61 }
  0x2f   :  { %3212 = vmatprep.subr.bf16.mxu0 %v4523_v62  ;;  %3253 = vmatprep.subr.bf16.mxu1 %v4526_v0  ;;  %v4575_v62 = vld [vmem:[%s6747_s3 + $0x888] ss:$28 sps:$4 sm:$0xff]  }
  0x32   :  { %3213 = vmatpush1.bf16.msra.mxu0 %v4521_v63  ;;  %3254 = vmatpush1.bf16.msra.mxu1 %v4524_v1  ;;  %v4578_v1 = vld [vmem:[%s6747_s3 + $0xc08] ss:$28 sps:$4 sm:$0xff]  }
  0x33   :  { %3214 = vmatprep.subr.bf16.mxu0 %v4529_v2  ;;  %3255 = vmatprep.subr.bf16.mxu1 %v4532_v3  ;;  %v4583_v2 = vld [vmem:[%s6747_s3 + $0x854] ss:$28 sps:$4 sm:$0xff]  }
  0x36   :  { %3215 = vmatpush2.bf16.msra.mxu0 %v4527_v4  ;;  %3256 = vmatpush2.bf16.msra.mxu1 %v4530_v5 }
  0x37   :  { %3216 = vmatprep.subr.bf16.mxu0 %v4535_v6  ;;  %3257 = vmatprep.subr.bf16.mxu1 %v4538_v7  ;;  %v4586_v6 = vld [vmem:[%s6747_s3 + $0xbd4] ss:$28 sps:$4 sm:$0xff]   ;;  %v64_v7 = vrot.slane %v5459_v38, %v63_v54 }
  0x3a   :  { %3217 = vmatpush2.bf16.msra.mxu0 %v4533_v8  ;;  %3258 = vmatpush2.bf16.msra.mxu1 %v4536_v9 }
  0x3b   :  { %3218 = vmatprep.subr.bf16.mxu0 %v4541_v10  ;;  %3259 = vmatprep.subr.bf16.mxu1 %v4544_v11  ;;  %v72_v11 = vrot.slane %v5459_v38, %v71_v59  ;;  %v4623_v59 = vld [vmem:[%s6747_s3 + $0xa48] ss:$28 sps:$4 sm:$0xff]  }
  0x3e   :  { %3219 = vmatpush2.bf16.msra.mxu0 %v4539_v12  ;;  %3260 = vmatpush2.bf16.msra.mxu1 %v4542_v13 }
  0x3f   :  { %3220 = vmatprep.subr.bf16.mxu0 %v4547_v14  ;;  %3261 = vmatprep.subr.bf16.mxu1 %v4550_v15  ;;  %v4581_v14 = vld [vmem:[%s6747_s3 + $0x850] ss:$28 sps:$4 sm:$0xff]  }
  0x40   :  { %v4584_v15 = vld [vmem:[%s6747_s3 + $0xbd0] ss:$28 sps:$4 sm:$0xff]  }
  0x42   :  { %3221 = vmatpush2.bf16.msra.mxu0 %v4545_v16  ;;  %3262 = vmatpush2.bf16.msra.mxu1 %v4548_v17 }
  0x43   :  { %3222 = vmatprep.subr.bf16.mxu0 %v4553_v18  ;;  %3263 = vmatprep.subr.bf16.mxu1 %v4556_v19  ;;  %v4589_v18 = vld [vmem:[%s6747_s3 + $0x81c] ss:$28 sps:$4 sm:$0xff]  }
  0x46   :  { %3223 = vmatpush2.bf16.msra.mxu0 %v4551_v20  ;;  %3264 = vmatpush2.bf16.msra.mxu1 %v4554_v21  ;;  %v4592_v21 = vld [vmem:[%s6747_s3 + $0xb9c] ss:$28 sps:$4 sm:$0xff]  }
  0x47   :  { %3224 = vmatprep.subr.bf16.mxu0 %v4559_v22  ;;  %3265 = vmatprep.subr.bf16.mxu1 %v4562_v23 }
  0x4a   :  { %3225 = vmatpush2.bf16.msra.mxu0 %v4557_v24  ;;  %3266 = vmatpush2.bf16.msra.mxu1 %v4560_v25  ;;  %v4587_v24 = vld [vmem:[%s6747_s3 + $0x818] ss:$28 sps:$4 sm:$0xff]  }
  0x4b   :  { %3226 = vmatprep.subr.bf16.mxu0 %v4565_v26  ;;  %3267 = vmatprep.subr.bf16.mxu1 %v4568_v27 }
  0x4e   :  { %3227 = vmatpush2.bf16.msra.mxu0 %v4563_v28  ;;  %3268 = vmatpush2.bf16.msra.mxu1 %v4566_v29  ;;  %v4590_v29 = vld [vmem:[%s6747_s3 + $0xb98] ss:$28 sps:$4 sm:$0xff]  }
  0x4f   :  { %3228 = vmatprep.subr.bf16.mxu0 %v4571_v30  ;;  %3269 = vmatprep.subr.bf16.mxu1 %v4574_v31  ;;  %v4595_v30 = vld [vmem:[%s6747_s3 + $0x7e4] ss:$28 sps:$4 sm:$0xff]  }
  0x52   :  { %3229 = vmatpush2.bf16.msra.mxu0 %v4569_v32  ;;  %3270 = vmatpush2.bf16.msra.mxu1 %v4572_v33  ;;  %v4593_v32 = vld [vmem:[%s6747_s3 + $0x7e0] ss:$28 sps:$4 sm:$0xff]  }
  0x53   :  { %3280 = vmatprep.subr.bf16.mxu0 %v4577_v34  ;;  %3321 = vmatprep.subr.bf16.mxu1 %v4580_v35  ;;  %v4598_v33 = vld [vmem:[%s6747_s3 + $0xb64] ss:$28 sps:$4 sm:$0xff]   ;;  %v4601_v35 = vld [vmem:[%s6747_s3 + $0x7ac] ss:$28 sps:$4 sm:$0xff]  }
  0x54   :  { %v4596_v34 = vld [vmem:[%s6747_s3 + $0xb60] ss:$28 sps:$4 sm:$0xff]  }
  0xcd   :  { %v199_v46 = vpop.f32.mrf.mxu0  ;;  %v240_v49 = vpop.f32.mrf.mxu1 }
  0xce   :  { %v200_v48 = vadd.f32 %v199_v46, %v44_v43  ;;  %v241_v50 = vadd.f32 %v240_v49, %v52_v44  ;;  %v4604_v43 = vld [vmem:[%s6747_s3 + $0xb2c] ss:$28 sps:$4 sm:$0xff]   ;;  %v4613_v49 = vld [vmem:[%s6747_s3 + $0x73c] ss:$28 sps:$4 sm:$0xff]  }
  0xcf   :  { %v201_v51 = vpop.f32.mrf.mxu0  ;;  %v242_v53 = vpop.f32.mrf.mxu1  ;;  %v4602_v44 = vld [vmem:[%s6747_s3 + $0xb28] ss:$28 sps:$4 sm:$0xff]   ;;  %v4605_v46 = vld [vmem:[%s6747_s3 + $0x770] ss:$28 sps:$4 sm:$0xff]  }
  0xd0   :  { %v202_v52 = vadd.f32 %v201_v51, %v48_v45  ;;  %v329_v55 = vmax.f32 %v200_v48, 0.0  ;;  %v331_v56 = vmax.f32 %v241_v50, 0.0  ;;  %v243_v57 = vadd.f32 %v242_v53, %v56_v47  ;;  %v4607_v45 = vld [vmem:[%s6747_s3 + $0x774] ss:$28 sps:$4 sm:$0xff]   ;;  %v4616_v51 = vld [vmem:[%s6747_s3 + $0xabc] ss:$28 sps:$4 sm:$0xff]  }
  0xd1   :  { %v203_v58 = vpop.f32.mrf.mxu0  ;;  %v244_v61 = vpop.f32.mrf.mxu1  ;;  %v4610_v47 = vld [vmem:[%s6747_s3 + $0xaf4] ss:$28 sps:$4 sm:$0xff]   ;;  %v4619_v53 = vld [vmem:[%s6747_s3 + $0x704] ss:$28 sps:$4 sm:$0xff]  }
  0xd2   :  { %v330_v60 = vmax.f32 %v202_v52, 0.0  ;;  %v332_v63 = vmax.f32 %v243_v57, 0.0  ;;  %v5488_v3 = vpack.c.bf16 %v331_v56, %v331_v56  ;;  %v5498_v8 = vpack.c.bf16 %v329_v55, %v329_v55  ;;  %v4608_v48 = vld [vmem:[%s6747_s3 + $0xaf0] ss:$28 sps:$4 sm:$0xff]   ;;  %v4611_v50 = vld [vmem:[%s6747_s3 + $0x738] ss:$28 sps:$4 sm:$0xff]  }
  0xd3   :  { %v204_v0 = vpop.f32.mrf.mxu0  ;;  %v245_v5 = vpop.f32.mrf.mxu1  ;;  %v4614_v52 = vld [vmem:[%s6747_s3 + $0xab8] ss:$28 sps:$4 sm:$0xff]   ;;  %v4617_v55 = vld [vmem:[%s6747_s3 + $0x700] ss:$28 sps:$4 sm:$0xff]   ;;  %v4625_v58 = vld [vmem:[%s6747_s3 + $0xa4c] ss:$28 sps:$4 sm:$0xff]  }
  0xd4   :  { %v5490_v4 = vpack.c.bf16 %v330_v60, %v330_v60  ;;  %v5500_v9 = vpack.c.bf16 %v332_v63, %v332_v63  ;;  %v4622_v56 = vld [vmem:[%s6747_s3 + $0xa84] ss:$28 sps:$4 sm:$0xff]   ;;  %v4628_v60 = vld [vmem:[%s6747_s3 + $0xdcc] ss:$28 sps:$4 sm:$0xff]   ;;  %v4634_v0 = vld [vmem:[%s6747_s3 + $0xd94] ss:$28 sps:$4 sm:$0xff]  }
  0xd5   :  { %v5502_v10 = vpop.f32.mrf.mxu0  ;;  %v5506_v12 = vpop.f32.mrf.mxu1  ;;  %v4620_v57 = vld [vmem:[%s6747_s3 + $0xa80] ss:$28 sps:$4 sm:$0xff]   ;;  %v4626_v61 = vld [vmem:[%s6747_s3 + $0xdc8] ss:$28 sps:$4 sm:$0xff]   ;;  %v4629_v63 = vld [vmem:[%s6747_s3 + $0xa10] ss:$28 sps:$4 sm:$0xff]  }
  0xd6   :  { %3230 = vmatprep.mubr.bf16.mxu0 %v5490_v4  ;;  %3271 = vmatprep.mubr.bf16.mxu1 %v5500_v9  ;;  %v4635_v5 = vld [vmem:[%s6747_s3 + $0x9d8] ss:$28 sps:$4 sm:$0xff]  }
  0xd7   :  { %3231 = vmatmul.mubr.bf16.vlgmr.msra.gmra.mxu0 %v5498_v8  ;;  %v283_v13 = vpop.f32.mrf.mxu0  ;;  %3272 = vmatmul.mubr.bf16.vlgmr.msra.gmra.mxu1 %v5488_v3  ;;  %v324_v17 = vpop.f32.mrf.mxu1 }
  0xd8   :  { %3281 = vmatpush1.bf16.msra.mxu0 %v4575_v62  ;;  %v284_v16 = vadd.f32 %v283_v13, %v64_v7  ;;  %3322 = vmatpush1.bf16.msra.mxu1 %v4578_v1  ;;  %v325_v20 = vadd.f32 %v324_v17, %v72_v11  ;;  %v4631_v62 = vld [vmem:[%s6747_s3 + $0xa14] ss:$28 sps:$4 sm:$0xff]   ;;  %v4643_v11 = vld [vmem:[%s6747_s3 + $0x9a4] ss:$28 sps:$4 sm:$0xff]   ;;  %v4652_v17 = vld [vmem:[%s6747_s3 + $0xcec] ss:$28 sps:$4 sm:$0xff]  }
  0xd9   :  { %3282 = vmatprep.subr.bf16.mxu0 %v4583_v2  ;;  %v285_v19 = vpop.f32.mrf.mxu0  ;;  %3323 = vmatprep.subr.bf16.mxu1 %v4586_v6  ;;  %v326_v23 = vpop.f32.mrf.mxu1  ;;  %v4632_v1 = vld [vmem:[%s6747_s3 + $0xd90] ss:$28 sps:$4 sm:$0xff]   ;;  %v4637_v2 = vld [vmem:[%s6747_s3 + $0x9dc] ss:$28 sps:$4 sm:$0xff]  }
  0xda   :  { %v334_v22 = vmax.f32 %v284_v16, 0.0  ;;  %v336_v25 = vmax.f32 %v325_v20, 0.0  ;;  %v4640_v6 = vld [vmem:[%s6747_s3 + $0xd5c] ss:$28 sps:$4 sm:$0xff]   ;;  %v4649_v16 = vld [vmem:[%s6747_s3 + $0x96c] ss:$28 sps:$4 sm:$0xff]  }
  0xdb   :  { %v286_v26 = vpop.f32.mrf.mxu0  ;;  %v327_v28 = vpop.f32.mrf.mxu1  ;;  %v4638_v7 = vld [vmem:[%s6747_s3 + $0xd58] ss:$28 sps:$4 sm:$0xff]   ;;  %v4641_v13 = vld [vmem:[%s6747_s3 + $0x9a0] ss:$28 sps:$4 sm:$0xff]   ;;  %v67_v19 = vsub.s32 6, %v5454_v37 }
  0xdc   :  { %3283 = vmatpush1.bf16.msra.mxu0 %v4581_v14  ;;  %v5526_v27 = vpack.c.bf16 %v334_v22, %v334_v22  ;;  %3324 = vmatpush1.bf16.msra.mxu1 %v4584_v15  ;;  %v5534_v31 = vpack.c.bf16 %v336_v25, %v336_v25  ;;  %v4646_v14 = vld [vmem:[%s6747_s3 + $0xd24] ss:$28 sps:$4 sm:$0xff]   ;;  %v4655_v22 = vld [vmem:[%s6747_s3 + $0x934] ss:$28 sps:$4 sm:$0xff]  }
  0xdd   :  { %3284 = vmatprep.subr.bf16.mxu0 %v4589_v18  ;;  %3325 = vmatprep.subr.bf16.mxu1 %v4592_v21  ;;  %v4644_v15 = vld [vmem:[%s6747_s3 + $0xd20] ss:$28 sps:$4 sm:$0xff]   ;;  %v4647_v18 = vld [vmem:[%s6747_s3 + $0x968] ss:$28 sps:$4 sm:$0xff]   ;;  %v59_v21 = vsub.s32 4, %v5454_v37 }
  0xde   :  { %3312 = vmatprep.mubr.bf16.mxu0 %v5526_v27  ;;  %3353 = vmatprep.mubr.bf16.mxu1 %v5534_v31  ;;  %v4650_v20 = vld [vmem:[%s6747_s3 + $0xce8] ss:$28 sps:$4 sm:$0xff]   ;;  %v4658_v23 = vld [vmem:[%s6747_s3 + $0xcb4] ss:$28 sps:$4 sm:$0xff]  }
  0xe0   :  { %3285 = vmatpush1.bf16.msra.mxu0 %v4587_v24  ;;  %3326 = vmatpush1.bf16.msra.mxu1 %v4590_v29 }
  0xe1   :  { %3286 = vmatprep.subr.bf16.mxu0 %v4595_v30  ;;  %3327 = vmatprep.subr.bf16.mxu1 %v4598_v33 }
  0xe4   :  { %3287 = vmatpush1.bf16.msra.mxu0 %v4593_v32  ;;  %3328 = vmatpush1.bf16.msra.mxu1 %v4596_v34 }
  0xe5   :  { %3288 = vmatprep.subr.bf16.mxu0 %v4601_v35  ;;  %3329 = vmatprep.subr.bf16.mxu1 %v4604_v43 }
  0xe8   :  { %3289 = vmatpush1.bf16.msra.mxu0 %v4599_v36  ;;  %3330 = vmatpush1.bf16.msra.mxu1 %v4602_v44 }
  0xe9   :  { %3290 = vmatprep.subr.bf16.mxu0 %v4607_v45  ;;  %3331 = vmatprep.subr.bf16.mxu1 %v4610_v47 }
  0xec   :  { %3291 = vmatpush1.bf16.msra.mxu0 %v4605_v46  ;;  %3332 = vmatpush1.bf16.msra.mxu1 %v4608_v48 }
  0xed   :  { %3292 = vmatprep.subr.bf16.mxu0 %v4613_v49  ;;  %3333 = vmatprep.subr.bf16.mxu1 %v4616_v51 }
  0xf0   :  { %3293 = vmatpush1.bf16.msra.mxu0 %v4611_v50  ;;  %3334 = vmatpush1.bf16.msra.mxu1 %v4614_v52 }
  0xf1   :  { %3294 = vmatprep.subr.bf16.mxu0 %v4619_v53  ;;  %3335 = vmatprep.subr.bf16.mxu1 %v4622_v56 }
  0xf4   :  { %3295 = vmatpush1.bf16.msra.mxu0 %v4617_v55  ;;  %3336 = vmatpush1.bf16.msra.mxu1 %v4620_v57 }
  0xf5   :  { %3296 = vmatprep.subr.bf16.mxu0 %v4625_v58  ;;  %3337 = vmatprep.subr.bf16.mxu1 %v4628_v60 }
  0xf8   :  { %3297 = vmatpush2.bf16.msra.mxu0 %v4623_v59  ;;  %3338 = vmatpush2.bf16.msra.mxu1 %v4626_v61 }
  0xf9   :  { %3298 = vmatprep.subr.bf16.mxu0 %v4631_v62  ;;  %3339 = vmatprep.subr.bf16.mxu1 %v4634_v0 }
  0xfc   :  { %3299 = vmatpush2.bf16.msra.mxu0 %v4629_v63  ;;  %3340 = vmatpush2.bf16.msra.mxu1 %v4632_v1 }
  0xfd   :  { %3300 = vmatprep.subr.bf16.mxu0 %v4637_v2  ;;  %3341 = vmatprep.subr.bf16.mxu1 %v4640_v6 }
 0x100   :  { %3301 = vmatpush2.bf16.msra.mxu0 %v4635_v5  ;;  %3342 = vmatpush2.bf16.msra.mxu1 %v4638_v7 }
 0x101   :  { %3302 = vmatprep.subr.bf16.mxu0 %v4643_v11  ;;  %3343 = vmatprep.subr.bf16.mxu1 %v4646_v14 }
 0x104   :  { %3303 = vmatpush2.bf16.msra.mxu0 %v4641_v13  ;;  %3344 = vmatpush2.bf16.msra.mxu1 %v4644_v15 }
 0x105   :  { %3304 = vmatprep.subr.bf16.mxu0 %v4649_v16  ;;  %3345 = vmatprep.subr.bf16.mxu1 %v4652_v17 }
 0x106   :  { %10 = vsyncpa [#allocation3], 0  ;;  %v68_v24 = vrot.slane %v5459_v38, %v67_v19  ;;  %v4653_v25 = vld [vmem:[%s6747_s3 + $0x930] ss:$28 sps:$4 sm:$0xff]   ;;  %v60_v26 = vrot.slane %v5459_v38, %v59_v21  ;;  %v4661_v29 = vld [vmem:[%s6747_s3 + $0x8fc] ss:$28 sps:$4 sm:$0xff]  }
 0x107   :  { %v4656_v28 = vld [vmem:[%s6747_s3 + $0xcb0] ss:$28 sps:$4 sm:$0xff]   ;;  %v4664_v30 = vld [vmem:[%s6747_s3 + $0xc7c] ss:$28 sps:$4 sm:$0xff]   ;;  %v4667_v35 = vld [vmem:[%s6747_s3 + $0x8c4] ss:$28 sps:$4 sm:$0xff]  }
 0x108   :  { %3305 = vmatpush2.bf16.msra.mxu0 %v4647_v18  ;;  %3346 = vmatpush2.bf16.msra.mxu1 %v4650_v20  ;;  %v323_v32 = vadd.f32 %v5506_v12, %v68_v24  ;;  %v4659_v38 = vld [vmem:[%s6747_s3 + $0x8f8] ss:$28 sps:$4 sm:$0xff]   ;;  %v282_v33 = vadd.f32 %v5502_v10, %v60_v26  ;;  %v4670_v12 = vld [vmem:[%s6747_s3 + $0xc44] ss:$28 sps:$4 sm:$0xff]   ;;  %v4671_v48 = vld [vmem:[%s6747_s3 + $0x190] ss:$28 sps:$4 sm:$0xff]  }
 0x109   :  { %3306 = vmatprep.subr.bf16.mxu0 %v4655_v22  ;;  %3347 = vmatprep.subr.bf16.mxu1 %v4658_v23  ;;  %v4662_v34 = vld [vmem:[%s6747_s3 + $0xc78] ss:$28 sps:$4 sm:$0xff]   ;;  %v4665_v10 = vld [vmem:[%s6747_s3 + $0x8c0] ss:$28 sps:$4 sm:$0xff]   ;;  %v4674_v50 = vld [vmem:[%s6747_s3 + $0x510] ss:$28 sps:$4 sm:$0xff]  }
 0x10a   :  { %v335_v36 = vmax.f32 %v323_v32, 0.0  ;;  %v333_v43 = vmax.f32 %v282_v33, 0.0  ;;  %v4668_v44 = vld [vmem:[%s6747_s3 + $0xc40] ss:$28 sps:$4 sm:$0xff]   ;;  %v4673_v45 = vld [vmem:[%s6747_s3 + $0x194] ss:$28 sps:$4 sm:$0xff]  }
 0x10b   :  { %v4676_v46 = vld [vmem:[%s6747_s3 + $0x514] ss:$28 sps:$4 sm:$0xff]   ;;  %v4679_v51 = vld [vmem:[%s6747_s3 + $0x15c] ss:$28 sps:$4 sm:$0xff]   ;;  %v4685_v56 = vld [vmem:[%s6747_s3 + $0x124] ss:$28 sps:$4 sm:$0xff]  }
 0x10c   :  { %3307 = vmatpush2.bf16.msra.mxu0 %v4653_v25  ;;  %3348 = vmatpush2.bf16.msra.mxu1 %v4656_v28  ;;  %v5707_v47 = vpack.c.bf16 %v335_v36, %v335_v36  ;;  %v5712_v49 = vpack.c.bf16 %v333_v43, %v333_v43  ;;  %v4682_v52 = vld [vmem:[%s6747_s3 + $0x4dc] ss:$28 sps:$4 sm:$0xff]   ;;  %v4688_v57 = vld [vmem:[%s6747_s3 + $0x4a4] ss:$28 sps:$4 sm:$0xff]   ;;  %v4691_v60 = vld [vmem:[%s6747_s3 + $0xec] ss:$28 sps:$4 sm:$0xff]  }
 0x10d   :  { %3308 = vmatprep.subr.bf16.mxu0 %v4661_v29  ;;  %3349 = vmatprep.subr.bf16.mxu1 %v4664_v30  ;;  %v4677_v53 = vld [vmem:[%s6747_s3 + $0x158] ss:$28 sps:$4 sm:$0xff]   ;;  %v4683_v58 = vld [vmem:[%s6747_s3 + $0x120] ss:$28 sps:$4 sm:$0xff]   ;;  %v4694_v61 = vld [vmem:[%s6747_s3 + $0x46c] ss:$28 sps:$4 sm:$0xff]  }
 0x10e   :  { %v4680_v55 = vld [vmem:[%s6747_s3 + $0x4d8] ss:$28 sps:$4 sm:$0xff]   ;;  %v4686_v59 = vld [vmem:[%s6747_s3 + $0x4a0] ss:$28 sps:$4 sm:$0xff]   ;;  %v4689_v62 = vld [vmem:[%s6747_s3 + $0xe8] ss:$28 sps:$4 sm:$0xff]  }
 0x10f   :  { %v4692_v63 = vld [vmem:[%s6747_s3 + $0x468] ss:$28 sps:$4 sm:$0xff]   ;;  %v4697_v0 = vld [vmem:[%s6747_s3 + $0xb4] ss:$28 sps:$4 sm:$0xff]   ;;  %v4703_v6 = vld [vmem:[%s6747_s3 + $0x7c] ss:$28 sps:$4 sm:$0xff]  }
 0x110   :  { %3309 = vmatpush2.bf16.msra.mxu0 %v4659_v38  ;;  %3350 = vmatpush2.bf16.msra.mxu1 %v4662_v34  ;;  %v4700_v1 = vld [vmem:[%s6747_s3 + $0x434] ss:$28 sps:$4 sm:$0xff]   ;;  %v4706_v7 = vld [vmem:[%s6747_s3 + $0x3fc] ss:$28 sps:$4 sm:$0xff]   ;;  %v4709_v14 = vld [vmem:[%s6747_s3 + $0x44] ss:$28 sps:$4 sm:$0xff]  }
 0x111   :  { %3310 = vmatprep.subr.bf16.mxu0 %v4667_v35  ;;  %3351 = vmatprep.subr.bf16.mxu1 %v4670_v12  ;;  %v4695_v2 = vld [vmem:[%s6747_s3 + $0xb0] ss:$28 sps:$4 sm:$0xff]   ;;  %v4701_v11 = vld [vmem:[%s6747_s3 + $0x78] ss:$28 sps:$4 sm:$0xff]   ;;  %v4712_v15 = vld [vmem:[%s6747_s3 + $0x3c4] ss:$28 sps:$4 sm:$0xff]  }
 0x112   :  { %v4698_v5 = vld [vmem:[%s6747_s3 + $0x430] ss:$28 sps:$4 sm:$0xff]   ;;  %v4704_v13 = vld [vmem:[%s6747_s3 + $0x3f8] ss:$28 sps:$4 sm:$0xff]   ;;  %v4707_v16 = vld [vmem:[%s6747_s3 + $0x40] ss:$28 sps:$4 sm:$0xff]  }
 0x113   :  { %v4710_v17 = vld [vmem:[%s6747_s3 + $0x3c0] ss:$28 sps:$4 sm:$0xff]   ;;  %v4715_v18 = vld [vmem:[%s6747_s3 + $0xc] ss:$28 sps:$4 sm:$0xff]   ;;  %v4721_v24 = vld [vmem:[%s6747_s3 + $0x354] ss:$28 sps:$4 sm:$0xff]  }
 0x114   :  { %3311 = vmatpush2.bf16.msra.mxu0 %v4665_v10  ;;  %3352 = vmatpush2.bf16.msra.mxu1 %v4668_v44  ;;  %v4718_v20 = vld [vmem:[%s6747_s3 + $0x38c] ss:$28 sps:$4 sm:$0xff]   ;;  %v4724_v25 = vld [vmem:[%s6747_s3 + $0x6d4] ss:$28 sps:$4 sm:$0xff]   ;;  %v4727_v29 = vld [vmem:[%s6747_s3 + $0x31c] ss:$28 sps:$4 sm:$0xff]  }
 0x115   :  { %3362 = vmatprep.subr.bf16.mxu0 %v4673_v45  ;;  %3403 = vmatprep.subr.bf16.mxu1 %v4676_v46  ;;  %v4713_v22 = vld [vmem:[%s6747_s3 + $0x8] ss:$28 sps:$4 sm:$0xff]   ;;  %v4719_v26 = vld [vmem:[%s6747_s3 + $0x350] ss:$28 sps:$4 sm:$0xff]   ;;  %v4730_v30 = vld [vmem:[%s6747_s3 + $0x69c] ss:$28 sps:$4 sm:$0xff]  }
 0x116   :  { %v4716_v23 = vld [vmem:[%s6747_s3 + $0x388] ss:$28 sps:$4 sm:$0xff]   ;;  %v4722_v28 = vld [vmem:[%s6747_s3 + $0x6d0] ss:$28 sps:$4 sm:$0xff]   ;;  %v4725_v32 = vld [vmem:[%s6747_s3 + $0x318] ss:$28 sps:$4 sm:$0xff]  }
 0x117   :  { %3313 = vmatmul.mubr.bf16.vlgmr.msra.gmra.mxu0 %v5712_v49  ;;  %3354 = vmatmul.mubr.bf16.vlgmr.msra.gmra.mxu1 %v5707_v47  ;;  %v4728_v38 = vld [vmem:[%s6747_s3 + $0x698] ss:$28 sps:$4 sm:$0xff]   ;;  %v4733_v33 = vld [vmem:[%s6747_s3 + $0x2e4] ss:$28 sps:$4 sm:$0xff]   ;;  %v4739_v36 = vld [vmem:[%s6747_s3 + $0x2ac] ss:$28 sps:$4 sm:$0xff]  }
 0x118   :  { %3363 = vmatpush1.bf16.msra.mxu0 %v4671_v48  ;;  %3394 = vmatprep.mubr.bf16.mxu0 %v5490_v4  ;;  %v4736_v34 = vld [vmem:[%s6747_s3 + $0x664] ss:$28 sps:$4 sm:$0xff]   ;;  %v4742_v10 = vld [vmem:[%s6747_s3 + $0x62c] ss:$28 sps:$4 sm:$0xff]   ;;  %v4745_v45 = vld [vmem:[%s6747_s3 + $0x274] ss:$28 sps:$4 sm:$0xff]  }
 0x119   :  { %3404 = vmatpush1.bf16.msra.mxu1 %v4674_v50  ;;  %3435 = vmatprep.mubr.bf16.mxu1 %v5500_v9  ;;  %v4731_v35 = vld [vmem:[%s6747_s3 + $0x2e0] ss:$28 sps:$4 sm:$0xff]   ;;  %v4737_v43 = vld [vmem:[%s6747_s3 + $0x2a8] ss:$28 sps:$4 sm:$0xff]   ;;  %v4748_v46 = vld [vmem:[%s6747_s3 + $0x5f4] ss:$28 sps:$4 sm:$0xff]  }
 0x11a   :  { %3364 = vmatprep.subr.bf16.mxu0 %v4679_v51  ;;  %3405 = vmatprep.subr.bf16.mxu1 %v4682_v52  ;;  %v4734_v12 = vld [vmem:[%s6747_s3 + $0x660] ss:$28 sps:$4 sm:$0xff]   ;;  %v4740_v44 = vld [vmem:[%s6747_s3 + $0x628] ss:$28 sps:$4 sm:$0xff]   ;;  %v4743_v48 = vld [vmem:[%s6747_s3 + $0x270] ss:$28 sps:$4 sm:$0xff]  }
 0x11b   :  { %v4746_v50 = vld [vmem:[%s6747_s3 + $0x5f0] ss:$28 sps:$4 sm:$0xff]   ;;  %v4751_v51 = vld [vmem:[%s6747_s3 + $0x23c] ss:$28 sps:$4 sm:$0xff]   ;;  %vm3898_vm1 = vcmask 130048  }
 0x11c   :  { %3365 = vmatpush1.bf16.msra.mxu0 %v4677_v53  ;;  %v4754_v52 = vld [vmem:[%s6747_s3 + $0x5bc] ss:$28 sps:$4 sm:$0xff]  }
 0x11d   :  { %3406 = vmatpush1.bf16.msra.mxu1 %v4680_v55  ;;  %3366 = vmatprep.subr.bf16.mxu0 %v4685_v56  ;;  %v4749_v53 = vld [vmem:[%s6747_s3 + $0x238] ss:$28 sps:$4 sm:$0xff]   ;;  %v4757_v56 = vld [vmem:[%s6747_s3 + $0x204] ss:$28 sps:$4 sm:$0xff]  }
 0x11e   :  { %3407 = vmatprep.subr.bf16.mxu1 %v4688_v57  ;;  %v4752_v55 = vld [vmem:[%s6747_s3 + $0x5b8] ss:$28 sps:$4 sm:$0xff]   ;;  %v4760_v57 = vld [vmem:[%s6747_s3 + $0x584] ss:$28 sps:$4 sm:$0xff]  }
 0x120   :  { %3367 = vmatpush1.bf16.msra.mxu0 %v4683_v58  ;;  %v4755_v58 = vld [vmem:[%s6747_s3 + $0x200] ss:$28 sps:$4 sm:$0xff]  }
 0x121   :  { %3408 = vmatpush1.bf16.msra.mxu1 %v4686_v59  ;;  %3368 = vmatprep.subr.bf16.mxu0 %v4691_v60  ;;  %v4758_v59 = vld [vmem:[%s6747_s3 + $0x580] ss:$28 sps:$4 sm:$0xff]   ;;  %v4763_v60 = vld [vmem:[%s6747_s3 + $0x1cc] ss:$28 sps:$4 sm:$0xff]  }
 0x122   :  { %3409 = vmatprep.subr.bf16.mxu1 %v4694_v61  ;;  %v4766_v61 = vld [vmem:[%s6747_s3 + $0x54c] ss:$28 sps:$4 sm:$0xff]  }
 0x124   :  { %3369 = vmatpush1.bf16.msra.mxu0 %v4689_v62  ;;  %v4761_v62 = vld [vmem:[%s6747_s3 + $0x1c8] ss:$28 sps:$4 sm:$0xff]  }
 0x125   :  { %3410 = vmatpush1.bf16.msra.mxu1 %v4692_v63  ;;  %3370 = vmatprep.subr.bf16.mxu0 %v4697_v0  ;;  %v4764_v63 = vld [vmem:[%s6747_s3 + $0x548] ss:$28 sps:$4 sm:$0xff]   ;;  %v4769_v0 = vld [vmem:[%s6747_s3 + $0x894] ss:$28 sps:$4 sm:$0xff]  }
 0x126   :  { %3411 = vmatprep.subr.bf16.mxu1 %v4700_v1  ;;  %v4772_v1 = vld [vmem:[%s6747_s3 + $0xc14] ss:$28 sps:$4 sm:$0xff]  }
 0x128   :  { %3371 = vmatpush1.bf16.msra.mxu0 %v4695_v2  ;;  %v4767_v2 = vld [vmem:[%s6747_s3 + $0x890] ss:$28 sps:$4 sm:$0xff]  }
 0x129   :  { %3412 = vmatpush1.bf16.msra.mxu1 %v4698_v5  ;;  %3372 = vmatprep.subr.bf16.mxu0 %v4703_v6  ;;  %v4770_v5 = vld [vmem:[%s6747_s3 + $0xc10] ss:$28 sps:$4 sm:$0xff]   ;;  %v4775_v6 = vld [vmem:[%s6747_s3 + $0x85c] ss:$28 sps:$4 sm:$0xff]  }
 0x12a   :  { %3413 = vmatprep.subr.bf16.mxu1 %v4706_v7  ;;  %v4778_v7 = vld [vmem:[%s6747_s3 + $0xbdc] ss:$28 sps:$4 sm:$0xff]  }
 0x12c   :  { %3373 = vmatpush1.bf16.msra.mxu0 %v4701_v11  ;;  %v4773_v11 = vld [vmem:[%s6747_s3 + $0x858] ss:$28 sps:$4 sm:$0xff]  }
 0x12d   :  { %3414 = vmatpush1.bf16.msra.mxu1 %v4704_v13  ;;  %3374 = vmatprep.subr.bf16.mxu0 %v4709_v14  ;;  %v4776_v13 = vld [vmem:[%s6747_s3 + $0xbd8] ss:$28 sps:$4 sm:$0xff]   ;;  %v4781_v14 = vld [vmem:[%s6747_s3 + $0x824] ss:$28 sps:$4 sm:$0xff]  }
 0x12e   :  { %3415 = vmatprep.subr.bf16.mxu1 %v4712_v15  ;;  %v4784_v15 = vld [vmem:[%s6747_s3 + $0xba4] ss:$28 sps:$4 sm:$0xff]  }
 0x130   :  { %3375 = vmatpush1.bf16.msra.mxu0 %v4707_v16  ;;  %v4779_v16 = vld [vmem:[%s6747_s3 + $0x820] ss:$28 sps:$4 sm:$0xff]  }
 0x131   :  { %3416 = vmatpush1.bf16.msra.mxu1 %v4710_v17  ;;  %3376 = vmatprep.subr.bf16.mxu0 %v4715_v18  ;;  %v4782_v17 = vld [vmem:[%s6747_s3 + $0xba0] ss:$28 sps:$4 sm:$0xff]   ;;  %v4787_v18 = vld [vmem:[%s6747_s3 + $0x7ec] ss:$28 sps:$4 sm:$0xff]  }
 0x132   :  { %3417 = vmatprep.subr.bf16.mxu1 %v4718_v20  ;;  %v4790_v20 = vld [vmem:[%s6747_s3 + $0xb6c] ss:$28 sps:$4 sm:$0xff]  }
 0x134   :  { %3377 = vmatpush1.bf16.msra.mxu0 %v4713_v22  ;;  %v4785_v22 = vld [vmem:[%s6747_s3 + $0x7e8] ss:$28 sps:$4 sm:$0xff]  }
 0x135   :  { %3418 = vmatpush1.bf16.msra.mxu1 %v4716_v23  ;;  %3378 = vmatprep.subr.bf16.mxu0 %v4721_v24  ;;  %v4788_v23 = vld [vmem:[%s6747_s3 + $0xb68] ss:$28 sps:$4 sm:$0xff]   ;;  %v4793_v24 = vld [vmem:[%s6747_s3 + $0x7b4] ss:$28 sps:$4 sm:$0xff]  }
 0x136   :  { %3419 = vmatprep.subr.bf16.mxu1 %v4724_v25  ;;  %v4796_v25 = vld [vmem:[%s6747_s3 + $0xb34] ss:$28 sps:$4 sm:$0xff]  }
 0x138   :  { %3379 = vmatpush2.bf16.msra.mxu0 %v4719_v26  ;;  %v4791_v26 = vld [vmem:[%s6747_s3 + $0x7b0] ss:$28 sps:$4 sm:$0xff]  }
 0x139   :  { %3420 = vmatpush2.bf16.msra.mxu1 %v4722_v28  ;;  %3380 = vmatprep.subr.bf16.mxu0 %v4727_v29  ;;  %v4794_v28 = vld [vmem:[%s6747_s3 + $0xb30] ss:$28 sps:$4 sm:$0xff]   ;;  %v4799_v29 = vld [vmem:[%s6747_s3 + $0x77c] ss:$28 sps:$4 sm:$0xff]  }
 0x13a   :  { %3421 = vmatprep.subr.bf16.mxu1 %v4730_v30  ;;  %v4802_v30 = vld [vmem:[%s6747_s3 + $0xafc] ss:$28 sps:$4 sm:$0xff]  }
 0x13c   :  { %3381 = vmatpush2.bf16.msra.mxu0 %v4725_v32  ;;  %v4797_v32 = vld [vmem:[%s6747_s3 + $0x778] ss:$28 sps:$4 sm:$0xff]  }
 0x13d   :  { %3422 = vmatpush2.bf16.msra.mxu1 %v4728_v38  ;;  %3382 = vmatprep.subr.bf16.mxu0 %v4733_v33  ;;  %v4800_v38 = vld [vmem:[%s6747_s3 + $0xaf8] ss:$28 sps:$4 sm:$0xff]   ;;  %v4805_v33 = vld [vmem:[%s6747_s3 + $0x744] ss:$28 sps:$4 sm:$0xff]  }
 0x13e   :  { %3423 = vmatprep.subr.bf16.mxu1 %v4736_v34  ;;  %v4808_v34 = vld [vmem:[%s6747_s3 + $0xac4] ss:$28 sps:$4 sm:$0xff]  }
 0x140   :  { %3383 = vmatpush2.bf16.msra.mxu0 %v4731_v35  ;;  %v4803_v35 = vld [vmem:[%s6747_s3 + $0x740] ss:$28 sps:$4 sm:$0xff]  }
 0x141   :  { %3424 = vmatpush2.bf16.msra.mxu1 %v4734_v12  ;;  %3384 = vmatprep.subr.bf16.mxu0 %v4739_v36  ;;  %v4806_v12 = vld [vmem:[%s6747_s3 + $0xac0] ss:$28 sps:$4 sm:$0xff]   ;;  %v4811_v36 = vld [vmem:[%s6747_s3 + $0x70c] ss:$28 sps:$4 sm:$0xff]  }
 0x142   :  { %3425 = vmatprep.subr.bf16.mxu1 %v4742_v10  ;;  %v4814_v10 = vld [vmem:[%s6747_s3 + $0xa8c] ss:$28 sps:$4 sm:$0xff]  }
 0x144   :  { %3385 = vmatpush2.bf16.msra.mxu0 %v4737_v43  ;;  %v4809_v43 = vld [vmem:[%s6747_s3 + $0x708] ss:$28 sps:$4 sm:$0xff]  }
 0x145   :  { %3426 = vmatpush2.bf16.msra.mxu1 %v4740_v44  ;;  %3386 = vmatprep.subr.bf16.mxu0 %v4745_v45  ;;  %v4812_v44 = vld [vmem:[%s6747_s3 + $0xa88] ss:$28 sps:$4 sm:$0xff]   ;;  %v4817_v45 = vld [vmem:[%s6747_s3 + $0xa54] ss:$28 sps:$4 sm:$0xff]  }
 0x146   :  { %3427 = vmatprep.subr.bf16.mxu1 %v4748_v46  ;;  %v4820_v46 = vld [vmem:[%s6747_s3 + $0xdd4] ss:$28 sps:$4 sm:$0xff]  }
 0x148   :  { %3387 = vmatpush2.bf16.msra.mxu0 %v4743_v48  ;;  %v4815_v48 = vld [vmem:[%s6747_s3 + $0xa50] ss:$28 sps:$4 sm:$0xff]  }
 0x149   :  { %3428 = vmatpush2.bf16.msra.mxu1 %v4746_v50  ;;  %3388 = vmatprep.subr.bf16.mxu0 %v4751_v51  ;;  %v4818_v50 = vld [vmem:[%s6747_s3 + $0xdd0] ss:$28 sps:$4 sm:$0xff]   ;;  %v4823_v51 = vld [vmem:[%s6747_s3 + $0xa1c] ss:$28 sps:$4 sm:$0xff]  }
 0x14a   :  { %3429 = vmatprep.subr.bf16.mxu1 %v4754_v52  ;;  %v4826_v52 = vld [vmem:[%s6747_s3 + $0xd9c] ss:$28 sps:$4 sm:$0xff]  }
 0x14c   :  { %3389 = vmatpush2.bf16.msra.mxu0 %v4749_v53  ;;  %v4821_v53 = vld [vmem:[%s6747_s3 + $0xa18] ss:$28 sps:$4 sm:$0xff]  }
 0x14d   :  { %3430 = vmatpush2.bf16.msra.mxu1 %v4752_v55  ;;  %3390 = vmatprep.subr.bf16.mxu0 %v4757_v56  ;;  %v4824_v55 = vld [vmem:[%s6747_s3 + $0xd98] ss:$28 sps:$4 sm:$0xff]   ;;  %v4829_v56 = vld [vmem:[%s6747_s3 + $0x9e4] ss:$28 sps:$4 sm:$0xff]  }
 0x14e   :  { %3431 = vmatprep.subr.bf16.mxu1 %v4760_v57  ;;  %v4832_v57 = vld [vmem:[%s6747_s3 + $0xd64] ss:$28 sps:$4 sm:$0xff]  }
 0x150   :  { %3391 = vmatpush2.bf16.msra.mxu0 %v4755_v58  ;;  %v4827_v58 = vld [vmem:[%s6747_s3 + $0x9e0] ss:$28 sps:$4 sm:$0xff]  }
 0x151   :  { %3432 = vmatpush2.bf16.msra.mxu1 %v4758_v59  ;;  %3392 = vmatprep.subr.bf16.mxu0 %v4763_v60  ;;  %v4830_v59 = vld [vmem:[%s6747_s3 + $0xd60] ss:$28 sps:$4 sm:$0xff]   ;;  %v4835_v60 = vld [vmem:[%s6747_s3 + $0x9ac] ss:$28 sps:$4 sm:$0xff]  }
 0x152   :  { %3433 = vmatprep.subr.bf16.mxu1 %v4766_v61  ;;  %v4838_v61 = vld [vmem:[%s6747_s3 + $0xd2c] ss:$28 sps:$4 sm:$0xff]  }
 0x154   :  { %3393 = vmatpush2.bf16.msra.mxu0 %v4761_v62  ;;  %v4833_v62 = vld [vmem:[%s6747_s3 + $0x9a8] ss:$28 sps:$4 sm:$0xff]  }
 0x155   :  { %3434 = vmatpush2.bf16.msra.mxu1 %v4764_v63  ;;  %3444 = vmatprep.subr.bf16.mxu0 %v4769_v0  ;;  %v4836_v63 = vld [vmem:[%s6747_s3 + $0xd28] ss:$28 sps:$4 sm:$0xff]   ;;  %v4841_v0 = vld [vmem:[%s6747_s3 + $0x974] ss:$28 sps:$4 sm:$0xff]  }
 0x156   :  { %3485 = vmatprep.subr.bf16.mxu1 %v4772_v1  ;;  %v4844_v1 = vld [vmem:[%s6747_s3 + $0xcf4] ss:$28 sps:$4 sm:$0xff]  }
 0x157   :  { %3395 = vmatmul.mubr.bf16.vlgmr.msra.gmra.mxu0 %v5498_v8 }
 0x158   :  { %3436 = vmatmul.mubr.bf16.vlgmr.msra.gmra.mxu1 %v5488_v3  ;;  %3445 = vmatpush1.bf16.msra.mxu0 %v4767_v2  ;;  %v4839_v2 = vld [vmem:[%s6747_s3 + $0x970] ss:$28 sps:$4 sm:$0xff]  }
 0x159   :  { %3476 = vmatprep.mubr.bf16.mxu0 %v5526_v27  ;;  %3486 = vmatpush1.bf16.msra.mxu1 %v4770_v5  ;;  %v4842_v5 = vld [vmem:[%s6747_s3 + $0xcf0] ss:$28 sps:$4 sm:$0xff]  }
 0x15a   :  { %3517 = vmatprep.mubr.bf16.mxu1 %v5534_v31  ;;  %3446 = vmatprep.subr.bf16.mxu0 %v4775_v6  ;;  %v4847_v6 = vld [vmem:[%s6747_s3 + $0x93c] ss:$28 sps:$4 sm:$0xff]  }
 0x15b   :  { %3487 = vmatprep.subr.bf16.mxu1 %v4778_v7  ;;  %v4850_v7 = vld [vmem:[%s6747_s3 + $0xcbc] ss:$28 sps:$4 sm:$0xff]  }
 0x15c   :  { %3447 = vmatpush1.bf16.msra.mxu0 %v4773_v11  ;;  %v4845_v11 = vld [vmem:[%s6747_s3 + $0x938] ss:$28 sps:$4 sm:$0xff]  }
 0x15d   :  { %3488 = vmatpush1.bf16.msra.mxu1 %v4776_v13  ;;  %3448 = vmatprep.subr.bf16.mxu0 %v4781_v14  ;;  %v4848_v13 = vld [vmem:[%s6747_s3 + $0xcb8] ss:$28 sps:$4 sm:$0xff]   ;;  %v4853_v14 = vld [vmem:[%s6747_s3 + $0x904] ss:$28 sps:$4 sm:$0xff]  }
 0x15e   :  { %3489 = vmatprep.subr.bf16.mxu1 %v4784_v15  ;;  %v4856_v15 = vld [vmem:[%s6747_s3 + $0xc84] ss:$28 sps:$4 sm:$0xff]  }
 0x160   :  { %3449 = vmatpush1.bf16.msra.mxu0 %v4779_v16  ;;  %v4851_v16 = vld [vmem:[%s6747_s3 + $0x900] ss:$28 sps:$4 sm:$0xff]  }
 0x161   :  { %3490 = vmatpush1.bf16.msra.mxu1 %v4782_v17  ;;  %3450 = vmatprep.subr.bf16.mxu0 %v4787_v18  ;;  %v4854_v17 = vld [vmem:[%s6747_s3 + $0xc80] ss:$28 sps:$4 sm:$0xff]   ;;  %v4859_v18 = vld [vmem:[%s6747_s3 + $0x8cc] ss:$28 sps:$4 sm:$0xff]  }
 0x162   :  { %3491 = vmatprep.subr.bf16.mxu1 %v4790_v20  ;;  %v4862_v20 = vld [vmem:[%s6747_s3 + $0xc4c] ss:$28 sps:$4 sm:$0xff]  }
 0x164   :  { %3451 = vmatpush1.bf16.msra.mxu0 %v4785_v22  ;;  %v4857_v22 = vld [vmem:[%s6747_s3 + $0x8c8] ss:$28 sps:$4 sm:$0xff]  }
 0x165   :  { %3492 = vmatpush1.bf16.msra.mxu1 %v4788_v23  ;;  %3452 = vmatprep.subr.bf16.mxu0 %v4793_v24  ;;  %v4860_v23 = vld [vmem:[%s6747_s3 + $0xc48] ss:$28 sps:$4 sm:$0xff]   ;;  %v4865_v24 = vld [vmem:[%s6747_s3 + $0x19c] ss:$28 sps:$4 sm:$0xff]  }
 0x166   :  { %3493 = vmatprep.subr.bf16.mxu1 %v4796_v25  ;;  %v4868_v25 = vld [vmem:[%s6747_s3 + $0x51c] ss:$28 sps:$4 sm:$0xff]  }
 0x168   :  { %3453 = vmatpush1.bf16.msra.mxu0 %v4791_v26  ;;  %v4863_v26 = vld [vmem:[%s6747_s3 + $0x198] ss:$28 sps:$4 sm:$0xff]  }
 0x169   :  { %3494 = vmatpush1.bf16.msra.mxu1 %v4794_v28  ;;  %3454 = vmatprep.subr.bf16.mxu0 %v4799_v29  ;;  %v4866_v28 = vld [vmem:[%s6747_s3 + $0x518] ss:$28 sps:$4 sm:$0xff]   ;;  %v4871_v29 = vld [vmem:[%s6747_s3 + $0x164] ss:$28 sps:$4 sm:$0xff]  }
 0x16a   :  { %3495 = vmatprep.subr.bf16.mxu1 %v4802_v30 }
 0x16c   :  { %3455 = vmatpush1.bf16.msra.mxu0 %v4797_v32  ;;  %v4874_v32 = vld [vmem:[%s6747_s3 + $0x4e4] ss:$28 sps:$4 sm:$0xff]  }
 0x16d   :  { %3496 = vmatpush1.bf16.msra.mxu1 %v4800_v38  ;;  %3456 = vmatprep.subr.bf16.mxu0 %v4805_v33  ;;  %v4869_v33 = vld [vmem:[%s6747_s3 + $0x160] ss:$28 sps:$4 sm:$0xff]  }
 0x16e   :  { %3497 = vmatprep.subr.bf16.mxu1 %v4808_v34 }
 0x170   :  { %3457 = vmatpush1.bf16.msra.mxu0 %v4803_v35  ;;  %v4872_v35 = vld [vmem:[%s6747_s3 + $0x4e0] ss:$28 sps:$4 sm:$0xff]  }
 0x171   :  { %3498 = vmatpush1.bf16.msra.mxu1 %v4806_v12  ;;  %3458 = vmatprep.subr.bf16.mxu0 %v4811_v36  ;;  %v4877_v12 = vld [vmem:[%s6747_s3 + $0x12c] ss:$28 sps:$4 sm:$0xff]  }
 0x172   :  { %3499 = vmatprep.subr.bf16.mxu1 %v4814_v10  ;;  %v4880_v10 = vld [vmem:[%s6747_s3 + $0x4ac] ss:$28 sps:$4 sm:$0xff]  }
 0x174   :  { %3459 = vmatpush1.bf16.msra.mxu0 %v4809_v43 }
 0x175   :  { %3500 = vmatpush1.bf16.msra.mxu1 %v4812_v44  ;;  %3460 = vmatprep.subr.bf16.mxu0 %v4817_v45  ;;  %v4875_v45 = vld [vmem:[%s6747_s3 + $0x128] ss:$28 sps:$4 sm:$0xff]  }
 0x176   :  { %3501 = vmatprep.subr.bf16.mxu1 %v4820_v46 }
 0x178   :  { %3461 = vmatpush2.bf16.msra.mxu0 %v4815_v48  ;;  %v4878_v48 = vld [vmem:[%s6747_s3 + $0x4a8] ss:$28 sps:$4 sm:$0xff]  }
 0x179   :  { %3502 = vmatpush2.bf16.msra.mxu1 %v4818_v50  ;;  %3462 = vmatprep.subr.bf16.mxu0 %v4823_v51  ;;  %v4883_v50 = vld [vmem:[%s6747_s3 + $0xf4] ss:$28 sps:$4 sm:$0xff]  }
 0x17a   :  { %3503 = vmatprep.subr.bf16.mxu1 %v4826_v52  ;;  %v4886_v52 = vld [vmem:[%s6747_s3 + $0x474] ss:$28 sps:$4 sm:$0xff]  }
 0x17c   :  { %3463 = vmatpush2.bf16.msra.mxu0 %v4821_v53  ;;  %v4881_v53 = vld [vmem:[%s6747_s3 + $0xf0] ss:$28 sps:$4 sm:$0xff]  }
 0x17d   :  { %3504 = vmatpush2.bf16.msra.mxu1 %v4824_v55  ;;  %3464 = vmatprep.subr.bf16.mxu0 %v4829_v56  ;;  %v4884_v55 = vld [vmem:[%s6747_s3 + $0x470] ss:$28 sps:$4 sm:$0xff]   ;;  %v4889_v56 = vld [vmem:[%s6747_s3 + $0xbc] ss:$28 sps:$4 sm:$0xff]  }
 0x17e   :  { %3505 = vmatprep.subr.bf16.mxu1 %v4832_v57  ;;  %v4892_v57 = vld [vmem:[%s6747_s3 + $0x43c] ss:$28 sps:$4 sm:$0xff]  }
 0x180   :  { %3465 = vmatpush2.bf16.msra.mxu0 %v4827_v58  ;;  %v4887_v58 = vld [vmem:[%s6747_s3 + $0xb8] ss:$28 sps:$4 sm:$0xff]  }
 0x181   :  { %3506 = vmatpush2.bf16.msra.mxu1 %v4830_v59  ;;  %3466 = vmatprep.subr.bf16.mxu0 %v4835_v60  ;;  %v4890_v59 = vld [vmem:[%s6747_s3 + $0x438] ss:$28 sps:$4 sm:$0xff]   ;;  %v4895_v60 = vld [vmem:[%s6747_s3 + $0x84] ss:$28 sps:$4 sm:$0xff]  }
 0x182   :  { %3507 = vmatprep.subr.bf16.mxu1 %v4838_v61  ;;  %v4898_v61 = vld [vmem:[%s6747_s3 + $0x404] ss:$28 sps:$4 sm:$0xff]  }
 0x184   :  { %3467 = vmatpush2.bf16.msra.mxu0 %v4833_v62  ;;  %v4893_v62 = vld [vmem:[%s6747_s3 + $0x80] ss:$28 sps:$4 sm:$0xff]  }
 0x185   :  { %3508 = vmatpush2.bf16.msra.mxu1 %v4836_v63  ;;  %3468 = vmatprep.subr.bf16.mxu0 %v4841_v0  ;;  %v4896_v63 = vld [vmem:[%s6747_s3 + $0x400] ss:$28 sps:$4 sm:$0xff]   ;;  %v4901_v0 = vld [vmem:[%s6747_s3 + $0x4c] ss:$28 sps:$4 sm:$0xff]  }
 0x186   :  { %3509 = vmatprep.subr.bf16.mxu1 %v4844_v1  ;;  %v4904_v1 = vld [vmem:[%s6747_s3 + $0x3cc] ss:$28 sps:$4 sm:$0xff]  }
 0x188   :  { %3469 = vmatpush2.bf16.msra.mxu0 %v4839_v2  ;;  %v4899_v2 = vld [vmem:[%s6747_s3 + $0x48] ss:$28 sps:$4 sm:$0xff]  }
 0x189   :  { %3510 = vmatpush2.bf16.msra.mxu1 %v4842_v5  ;;  %3470 = vmatprep.subr.bf16.mxu0 %v4847_v6  ;;  %v4902_v5 = vld [vmem:[%s6747_s3 + $0x3c8] ss:$28 sps:$4 sm:$0xff]   ;;  %v4907_v6 = vld [vmem:[%s6747_s3 + $0x14] ss:$28 sps:$4 sm:$0xff]  }
 0x18a   :  { %3511 = vmatprep.subr.bf16.mxu1 %v4850_v7  ;;  %v4910_v7 = vld [vmem:[%s6747_s3 + $0x394] ss:$28 sps:$4 sm:$0xff]  }
 0x18c   :  { %3471 = vmatpush2.bf16.msra.mxu0 %v4845_v11  ;;  %v4905_v11 = vld [vmem:[%s6747_s3 + $0x10] ss:$28 sps:$4 sm:$0xff]  }
 0x18d   :  { %3512 = vmatpush2.bf16.msra.mxu1 %v4848_v13  ;;  %3472 = vmatprep.subr.bf16.mxu0 %v4853_v14  ;;  %v4908_v13 = vld [vmem:[%s6747_s3 + $0x390] ss:$28 sps:$4 sm:$0xff]   ;;  %v4913_v14 = vld [vmem:[%s6747_s3 + $0x35c] ss:$28 sps:$4 sm:$0xff]  }
 0x18e   :  { %3513 = vmatprep.subr.bf16.mxu1 %v4856_v15  ;;  %v4916_v15 = vld [vmem:[%s6747_s3 + $0x6dc] ss:$28 sps:$4 sm:$0xff]  }
 0x190   :  { %3473 = vmatpush2.bf16.msra.mxu0 %v4851_v16  ;;  %v4911_v16 = vld [vmem:[%s6747_s3 + $0x358] ss:$28 sps:$4 sm:$0xff]  }
 0x191   :  { %3514 = vmatpush2.bf16.msra.mxu1 %v4854_v17  ;;  %3474 = vmatprep.subr.bf16.mxu0 %v4859_v18  ;;  %v4914_v17 = vld [vmem:[%s6747_s3 + $0x6d8] ss:$28 sps:$4 sm:$0xff]   ;;  %v4919_v18 = vld [vmem:[%s6747_s3 + $0x324] ss:$28 sps:$4 sm:$0xff]  }
 0x192   :  { %3515 = vmatprep.subr.bf16.mxu1 %v4862_v20  ;;  %v4922_v20 = vld [vmem:[%s6747_s3 + $0x6a4] ss:$28 sps:$4 sm:$0xff]  }
 0x194   :  { %3475 = vmatpush2.bf16.msra.mxu0 %v4857_v22  ;;  %v4917_v22 = vld [vmem:[%s6747_s3 + $0x320] ss:$28 sps:$4 sm:$0xff]  }
 0x195   :  { %3516 = vmatpush2.bf16.msra.mxu1 %v4860_v23  ;;  %3526 = vmatprep.subr.bf16.mxu0 %v4865_v24  ;;  %v4920_v23 = vld [vmem:[%s6747_s3 + $0x6a0] ss:$28 sps:$4 sm:$0xff]   ;;  %v4925_v24 = vld [vmem:[%s6747_s3 + $0x2ec] ss:$28 sps:$4 sm:$0xff]  }
 0x196   :  { %3567 = vmatprep.subr.bf16.mxu1 %v4868_v25  ;;  %v4928_v25 = vld [vmem:[%s6747_s3 + $0x66c] ss:$28 sps:$4 sm:$0xff]  }
 0x197   :  { %3477 = vmatmul.mubr.bf16.vlgmr.msra.gmra.mxu0 %v5712_v49  ;;  %v6113_v30 = vpop.f32.mrf.mxu0  ;;  %v6119_v38 = vpop.f32.mrf.mxu1 }
 0x198   :  { %3518 = vmatmul.mubr.bf16.vlgmr.msra.gmra.mxu1 %v5707_v47  ;;  %3527 = vmatpush1.bf16.msra.mxu0 %v4863_v26  ;;  %v4923_v26 = vld [vmem:[%s6747_s3 + $0x2e8] ss:$28 sps:$4 sm:$0xff]  }
 0x199   :  { %3558 = vmatprep.mubr.bf16.mxu0 %v5490_v4  ;;  %3568 = vmatpush1.bf16.msra.mxu1 %v4866_v28  ;;  %v6125_v34 = vpop.f32.mrf.mxu0  ;;  %v6134_v36 = vpop.f32.mrf.mxu1  ;;  %v4926_v28 = vld [vmem:[%s6747_s3 + $0x668] ss:$28 sps:$4 sm:$0xff]  }
 0x19a   :  { %3599 = vmatprep.mubr.bf16.mxu1 %v5500_v9  ;;  %3528 = vmatprep.subr.bf16.mxu0 %v4871_v29  ;;  %v4931_v29 = vld [vmem:[%s6747_s3 + $0x2b4] ss:$28 sps:$4 sm:$0xff]  }
 0x19b   :  { %3569 = vmatprep.subr.bf16.mxu1 %v4874_v32  ;;  %v3236_v43 = vpop.f32.mrf.mxu0  ;;  %v3277_v44 = vpop.f32.mrf.mxu1  ;;  %v4934_v32 = vld [vmem:[%s6747_s3 + $0x634] ss:$28 sps:$4 sm:$0xff]  }
 0x19c   :  { %3529 = vmatpush1.bf16.msra.mxu0 %v4869_v33  ;;  %v4929_v33 = vld [vmem:[%s6747_s3 + $0x2b0] ss:$28 sps:$4 sm:$0xff]   ;;  %v4935_v43 = vld [vmem:[%s6747_s3 + $0x278] ss:$28 sps:$4 sm:$0xff]  }
 0x19d   :  { %3570 = vmatpush1.bf16.msra.mxu1 %v4872_v35  ;;  %v3237_v46 = vpop.f32.mrf.mxu0  ;;  %3530 = vmatprep.subr.bf16.mxu0 %v4877_v12  ;;  %v3278_v51 = vpop.f32.mrf.mxu1  ;;  %v4932_v35 = vld [vmem:[%s6747_s3 + $0x630] ss:$28 sps:$4 sm:$0xff]   ;;  %v4937_v12 = vld [vmem:[%s6747_s3 + $0x27c] ss:$28 sps:$4 sm:$0xff]  }
 0x19e   :  { %3571 = vmatprep.subr.bf16.mxu1 %v4880_v10  ;;  %v4940_v10 = vld [vmem:[%s6747_s3 + $0x5fc] ss:$28 sps:$4 sm:$0xff]   ;;  %v4946_v46 = vld [vmem:[%s6747_s3 + $0x5c4] ss:$28 sps:$4 sm:$0xff]   ;;  %v4949_v51 = vld [vmem:[%s6747_s3 + $0x20c] ss:$28 sps:$4 sm:$0xff]  }
 0x19f   :  { %v4938_v44 = vld [vmem:[%s6747_s3 + $0x5f8] ss:$28 sps:$4 sm:$0xff]  }
 0x1a0   :  { %3531 = vmatpush1.bf16.msra.mxu0 %v4875_v45  ;;  %v4943_v45 = vld [vmem:[%s6747_s3 + $0x244] ss:$28 sps:$4 sm:$0xff]  }
 0x1a1   :  { %3572 = vmatpush1.bf16.msra.mxu1 %v4878_v48  ;;  %3532 = vmatprep.subr.bf16.mxu0 %v4883_v50  ;;  %v4941_v48 = vld [vmem:[%s6747_s3 + $0x240] ss:$28 sps:$4 sm:$0xff]  }
 0x1a2   :  { %3573 = vmatprep.subr.bf16.mxu1 %v4886_v52  ;;  %v4944_v50 = vld [vmem:[%s6747_s3 + $0x5c0] ss:$28 sps:$4 sm:$0xff]   ;;  %v4952_v52 = vld [vmem:[%s6747_s3 + $0x58c] ss:$28 sps:$4 sm:$0xff]  }
 0x1a4   :  { %3533 = vmatpush1.bf16.msra.mxu0 %v4881_v53  ;;  %v6286_v53 = vld [vmem:[%s6748_s4] sm:$0x7f] }
 0x1a5   :  { %3574 = vmatpush1.bf16.msra.mxu1 %v4884_v55  ;;  %3534 = vmatprep.subr.bf16.mxu0 %v4889_v56  ;;  %v4947_v55 = vld [vmem:[%s6747_s3 + $0x208] ss:$28 sps:$4 sm:$0xff]  }
 0x1a6   :  { %3575 = vmatprep.subr.bf16.mxu1 %v4892_v57  ;;  %v4950_v56 = vld [vmem:[%s6747_s3 + $0x588] ss:$28 sps:$4 sm:$0xff]   ;;  %v4955_v57 = vld [vmem:[%s6747_s3 + $0x1d4] ss:$28 sps:$4 sm:$0xff]  }
 0x1a8   :  { %3535 = vmatpush1.bf16.msra.mxu0 %v4887_v58  ;;  %v862_v58 = vrot.slane %v6286_v53, %v43_v39  ;;  %v4956_v39 = vld [vmem:[%s6747_s3 + $0x550] ss:$28 sps:$4 sm:$0xff]  }
 0x1a9   :  { %3576 = vmatpush1.bf16.msra.mxu1 %v4890_v59  ;;  %3536 = vmatprep.subr.bf16.mxu0 %v4895_v60  ;;  %v4958_v59 = vld [vmem:[%s6747_s3 + $0x554] ss:$28 sps:$4 sm:$0xff]   ;;  %v866_v60 = vrot.slane %v6286_v53, %v47_v41  ;;  %v4964_v41 = vld [vmem:[%s6747_s3 + $0xc1c] ss:$28 sps:$4 sm:$0xff]  }
 0x1aa   :  { %3577 = vmatprep.subr.bf16.mxu1 %v4898_v61  ;;  %v4953_v61 = vld [vmem:[%s6747_s3 + $0x1d0] ss:$28 sps:$4 sm:$0xff]  }
 0x1ac   :  { %3537 = vmatpush1.bf16.msra.mxu0 %v4893_v62  ;;  %v4961_v62 = vld [vmem:[%s6747_s3 + $0x89c] ss:$28 sps:$4 sm:$0xff]  }
 0x1ad   :  { %3578 = vmatpush1.bf16.msra.mxu1 %v4896_v63  ;;  %3538 = vmatprep.subr.bf16.mxu0 %v4901_v0  ;;  %v3233_v63 = vadd.f32 %v6113_v30, %v862_v58  ;;  %v3235_v0 = vadd.f32 %v6125_v34, %v866_v60  ;;  %v4970_v34 = vld [vmem:[%s6747_s3 + $0xbe4] ss:$28 sps:$4 sm:$0xff]  }
 0x1ae   :  { %3579 = vmatprep.subr.bf16.mxu1 %v4904_v1  ;;  %v4959_v1 = vld [vmem:[%s6747_s3 + $0x898] ss:$28 sps:$4 sm:$0xff]   ;;  %v4995_v60 = vld [vmem:[%s6747_s3 + $0x748] ss:$28 sps:$4 sm:$0xff]  }
 0x1af   :  { %v3274_v30 = vadd.f32 %v6119_v38, %v3233_v63  ;;  %v4965_v38 = vld [vmem:[%s6747_s3 + $0x860] ss:$28 sps:$4 sm:$0xff]  }
 0x1b0   :  { %3539 = vmatpush1.bf16.msra.mxu0 %v4899_v2  ;;  %v4962_v2 = vld [vmem:[%s6747_s3 + $0xc18] ss:$28 sps:$4 sm:$0xff]  }
 0x1b1   :  { %3580 = vmatpush1.bf16.msra.mxu1 %v4902_v5  ;;  %3540 = vmatprep.subr.bf16.mxu0 %v4907_v6  ;;  %v4967_v5 = vld [vmem:[%s6747_s3 + $0x864] ss:$28 sps:$4 sm:$0xff]  }
 0x1b2   :  { %3581 = vmatprep.subr.bf16.mxu1 %v4910_v7  ;;  %v3276_v7 = vadd.f32 %v6134_v36, %v3235_v0  ;;  %v4973_v36 = vld [vmem:[%s6747_s3 + $0x82c] ss:$28 sps:$4 sm:$0xff]  }
 0x1b3   :  { %v5001_v0 = vld [vmem:[%s6747_s3 + $0x710] ss:$28 sps:$4 sm:$0xff]  }
 0x1b4   :  { %3541 = vmatpush1.bf16.msra.mxu0 %v4905_v11 }
 0x1b5   :  { %3582 = vmatpush1.bf16.msra.mxu1 %v4908_v13  ;;  %3542 = vmatprep.subr.bf16.mxu0 %v4913_v14 }
 0x1b6   :  { %3583 = vmatprep.subr.bf16.mxu1 %v4916_v15  ;;  %v4968_v15 = vld [vmem:[%s6747_s3 + $0xbe0] ss:$28 sps:$4 sm:$0xff]  }
 0x1b8   :  { %3543 = vmatpush2.bf16.msra.mxu0 %v4911_v16 }
 0x1b9   :  { %3584 = vmatpush2.bf16.msra.mxu1 %v4914_v17  ;;  %3544 = vmatprep.subr.bf16.mxu0 %v4919_v18 }
 0x1ba   :  { %3585 = vmatprep.subr.bf16.mxu1 %v4922_v20  ;;  %v4976_v20 = vld [vmem:[%s6747_s3 + $0xbac] ss:$28 sps:$4 sm:$0xff]  }
 0x1bc   :  { %3545 = vmatpush2.bf16.msra.mxu0 %v4917_v22 }
 0x1bd   :  { %3586 = vmatpush2.bf16.msra.mxu1 %v4920_v23  ;;  %3546 = vmatprep.subr.bf16.mxu0 %v4925_v24 }
 0x1be   :  { %3587 = vmatprep.subr.bf16.mxu1 %v4928_v25 }
 0x1c0   :  { %3547 = vmatpush2.bf16.msra.mxu0 %v4923_v26  ;;  %v4971_v26 = vld [vmem:[%s6747_s3 + $0x828] ss:$28 sps:$4 sm:$0xff]  }
 0x1c1   :  { %3588 = vmatpush2.bf16.msra.mxu1 %v4926_v28  ;;  %3548 = vmatprep.subr.bf16.mxu0 %v4931_v29  ;;  %v4974_v29 = vld [vmem:[%s6747_s3 + $0xba8] ss:$28 sps:$4 sm:$0xff]  }
 0x1c2   :  { %3589 = vmatprep.subr.bf16.mxu1 %v4934_v32  ;;  %v4979_v32 = vld [vmem:[%s6747_s3 + $0x7f4] ss:$28 sps:$4 sm:$0xff]  }
 0x1c4   :  { %3549 = vmatpush2.bf16.msra.mxu0 %v4929_v33 }
 0x1c5   :  { %3590 = vmatpush2.bf16.msra.mxu1 %v4932_v35  ;;  %3550 = vmatprep.subr.bf16.mxu0 %v4937_v12  ;;  %v4982_v12 = vld [vmem:[%s6747_s3 + $0xb74] ss:$28 sps:$4 sm:$0xff]  }
 0x1c6   :  { %3591 = vmatprep.subr.bf16.mxu1 %v4940_v10  ;;  %v4977_v10 = vld [vmem:[%s6747_s3 + $0x7f0] ss:$28 sps:$4 sm:$0xff]  }
 0x1c8   :  { %3551 = vmatpush2.bf16.msra.mxu0 %v4935_v43  ;;  %v4980_v43 = vld [vmem:[%s6747_s3 + $0xb70] ss:$28 sps:$4 sm:$0xff]  }
 0x1c9   :  { %3592 = vmatpush2.bf16.msra.mxu1 %v4938_v44  ;;  %3552 = vmatprep.subr.bf16.mxu0 %v4943_v45  ;;  %v4985_v44 = vld [vmem:[%s6747_s3 + $0x7bc] ss:$28 sps:$4 sm:$0xff]  }
 0x1ca   :  { %3593 = vmatprep.subr.bf16.mxu1 %v4946_v46  ;;  %v4988_v45 = vld [vmem:[%s6747_s3 + $0xb3c] ss:$28 sps:$4 sm:$0xff]  }
 0x1cb   :  { %v4983_v46 = vld [vmem:[%s6747_s3 + $0x7b8] ss:$28 sps:$4 sm:$0xff]  }
 0x1cc   :  { %3553 = vmatpush2.bf16.msra.mxu0 %v4941_v48  ;;  %v4986_v48 = vld [vmem:[%s6747_s3 + $0xb38] ss:$28 sps:$4 sm:$0xff]  }
 0x1cd   :  { %3594 = vmatpush2.bf16.msra.mxu1 %v4944_v50  ;;  %3554 = vmatprep.subr.bf16.mxu0 %v4949_v51  ;;  %v4991_v50 = vld [vmem:[%s6747_s3 + $0x784] ss:$28 sps:$4 sm:$0xff]  }
 0x1ce   :  { %3595 = vmatprep.subr.bf16.mxu1 %v4952_v52  ;;  %v4994_v51 = vld [vmem:[%s6747_s3 + $0xb04] ss:$28 sps:$4 sm:$0xff]  }
 0x1cf   :  { %v4989_v52 = vld [vmem:[%s6747_s3 + $0x780] ss:$28 sps:$4 sm:$0xff]  }
 0x1d0   :  { %3555 = vmatpush2.bf16.msra.mxu0 %v4947_v55  ;;  %v4992_v55 = vld [vmem:[%s6747_s3 + $0xb00] ss:$28 sps:$4 sm:$0xff]  }
 0x1d1   :  { %3596 = vmatpush2.bf16.msra.mxu1 %v4950_v56  ;;  %3556 = vmatprep.subr.bf16.mxu0 %v4955_v57  ;;  %v4997_v56 = vld [vmem:[%s6747_s3 + $0x74c] ss:$28 sps:$4 sm:$0xff]  }
 0x1d2   :  { %3597 = vmatprep.subr.bf16.mxu1 %v4958_v59  ;;  %v5000_v57 = vld [vmem:[%s6747_s3 + $0xacc] ss:$28 sps:$4 sm:$0xff]  }
 0x1d4   :  { %3557 = vmatpush2.bf16.msra.mxu0 %v4953_v61 }
 0x1d5   :  { %3598 = vmatpush2.bf16.msra.mxu1 %v4956_v39  ;;  %3608 = vmatprep.subr.bf16.mxu0 %v4961_v62  ;;  %v4998_v39 = vld [vmem:[%s6747_s3 + $0xac8] ss:$28 sps:$4 sm:$0xff]   ;;  %v5003_v62 = vld [vmem:[%s6747_s3 + $0x714] ss:$28 sps:$4 sm:$0xff]  }
 0x1d6   :  { %3649 = vmatprep.subr.bf16.mxu1 %v4964_v41  ;;  %v5006_v41 = vld [vmem:[%s6747_s3 + $0xa94] ss:$28 sps:$4 sm:$0xff]  }
 0x1d7   :  { %v3314_v6 = vpop.f32.mrf.mxu0  ;;  %3559 = vmatmul.mubr.bf16.vlgmr.msra.gmra.mxu0 %v5498_v8  ;;  %v3355_v13 = vpop.f32.mrf.mxu1 }
 0x1d8   :  { %v3315_v11 = vadd.f32 %v3314_v6, %v3274_v30  ;;  %3600 = vmatmul.mubr.bf16.vlgmr.msra.gmra.mxu1 %v5488_v3  ;;  %3609 = vmatpush1.bf16.msra.mxu0 %v4959_v1  ;;  %v5004_v1 = vld [vmem:[%s6747_s3 + $0xa90] ss:$28 sps:$4 sm:$0xff]   ;;  %v5012_v30 = vld [vmem:[%s6747_s3 + $0xddc] ss:$28 sps:$4 sm:$0xff]  }
 0x1d9   :  { %3640 = vmatprep.mubr.bf16.mxu0 %v5526_v27  ;;  %3650 = vmatpush1.bf16.msra.mxu1 %v4962_v2  ;;  %v3316_v14 = vpop.f32.mrf.mxu0  ;;  %v3357_v18 = vpop.f32.mrf.mxu1  ;;  %v5009_v2 = vld [vmem:[%s6747_s3 + $0xa5c] ss:$28 sps:$4 sm:$0xff]  }
 0x1da   :  { %v3356_v16 = vadd.f32 %v3355_v13, %v3315_v11  ;;  %3681 = vmatprep.mubr.bf16.mxu1 %v5534_v31  ;;  %v3317_v17 = vadd.f32 %v3316_v14, %v3276_v7  ;;  %3610 = vmatprep.subr.bf16.mxu0 %v4967_v5  ;;  %v5007_v5 = vld [vmem:[%s6747_s3 + $0xa58] ss:$28 sps:$4 sm:$0xff]   ;;  %v5018_v7 = vld [vmem:[%s6747_s3 + $0xda4] ss:$28 sps:$4 sm:$0xff]   ;;  %v5024_v14 = vld [vmem:[%s6747_s3 + $0xd6c] ss:$28 sps:$4 sm:$0xff]  }
 0x1db   :  { %v3318_v22 = vpop.f32.mrf.mxu0  ;;  %3651 = vmatprep.subr.bf16.mxu1 %v4970_v34  ;;  %v3359_v25 = vpop.f32.mrf.mxu1  ;;  %v5010_v6 = vld [vmem:[%s6747_s3 + $0xdd8] ss:$28 sps:$4 sm:$0xff]   ;;  %v5015_v34 = vld [vmem:[%s6747_s3 + $0xa24] ss:$28 sps:$4 sm:$0xff]  }
 0x1dc   :  { %v4382_v23 = vmul.f32 -1.442695, %v3356_v16  ;;  %v3358_v24 = vadd.f32 %v3357_v18, %v3317_v17  ;;  %3611 = vmatpush1.bf16.msra.mxu0 %v4965_v38  ;;  %v5013_v11 = vld [vmem:[%s6747_s3 + $0xa20] ss:$28 sps:$4 sm:$0xff]   ;;  %v5021_v38 = vld [vmem:[%s6747_s3 + $0x9ec] ss:$28 sps:$4 sm:$0xff]  }
 0x1dd   :  { %3652 = vmatpush1.bf16.msra.mxu1 %v4968_v15  ;;  %v3319_v28 = vpop.f32.mrf.mxu0  ;;  %3612 = vmatprep.subr.bf16.mxu0 %v4973_v36  ;;  %v3360_v35 = vpop.f32.mrf.mxu1  ;;  %v5016_v13 = vld [vmem:[%s6747_s3 + $0xda0] ss:$28 sps:$4 sm:$0xff]   ;;  %v5019_v36 = vld [vmem:[%s6747_s3 + $0x9e8] ss:$28 sps:$4 sm:$0xff]   ;;  %v5027_v18 = vld [vmem:[%s6747_s3 + $0x9b4] ss:$28 sps:$4 sm:$0xff]  }
 0x1de   :  { %5119 = vpow2.f32 %v4382_v23  ;;  %v4383_v33 = vmul.f32 -1.442695, %v3358_v24  ;;  %3653 = vmatprep.subr.bf16.mxu1 %v4976_v20  ;;  %v5022_v17 = vld [vmem:[%s6747_s3 + $0xd68] ss:$28 sps:$4 sm:$0xff]   ;;  %v5030_v20 = vld [vmem:[%s6747_s3 + $0xd34] ss:$28 sps:$4 sm:$0xff]  }
 0x1df   :  { %v5025_v22 = vld [vmem:[%s6747_s3 + $0x9b0] ss:$28 sps:$4 sm:$0xff]   ;;  %v5033_v24 = vld [vmem:[%s6747_s3 + $0x97c] ss:$28 sps:$4 sm:$0xff]  }
 0x1e0   :  { %5121 = vpow2.f32 %v4383_v33  ;;  %3613 = vmatpush1.bf16.msra.mxu0 %v4971_v26  ;;  %v5028_v23 = vld [vmem:[%s6747_s3 + $0xd30] ss:$28 sps:$4 sm:$0xff]   ;;  %v5036_v25 = vld [vmem:[%s6747_s3 + $0xcfc] ss:$28 sps:$4 sm:$0xff]  }
 0x1e1   :  { %3654 = vmatpush1.bf16.msra.mxu1 %v4974_v29  ;;  %3614 = vmatprep.subr.bf16.mxu0 %v4979_v32  ;;  %v5031_v26 = vld [vmem:[%s6747_s3 + $0x978] ss:$28 sps:$4 sm:$0xff]   ;;  %v5039_v29 = vld [vmem:[%s6747_s3 + $0x944] ss:$28 sps:$4 sm:$0xff]  }
 0x1e2   :  { %3655 = vmatprep.subr.bf16.mxu1 %v4982_v12  ;;  %v5034_v28 = vld [vmem:[%s6747_s3 + $0xcf8] ss:$28 sps:$4 sm:$0xff]   ;;  %v5042_v32 = vld [vmem:[%s6747_s3 + $0xcc4] ss:$28 sps:$4 sm:$0xff]   ;;  %v5045_v12 = vld [vmem:[%s6747_s3 + $0x90c] ss:$28 sps:$4 sm:$0xff]  }
 0x1e3   :  { %v5037_v33 = vld [vmem:[%s6747_s3 + $0x940] ss:$28 sps:$4 sm:$0xff]  }
 0x1e4   :  { %3615 = vmatpush1.bf16.msra.mxu0 %v4977_v10  ;;  %v5040_v35 = vld [vmem:[%s6747_s3 + $0xcc0] ss:$28 sps:$4 sm:$0xff]   ;;  %v5048_v10 = vld [vmem:[%s6747_s3 + $0xc8c] ss:$28 sps:$4 sm:$0xff]  }
 0x1e5   :  { %3656 = vmatpush1.bf16.msra.mxu1 %v4980_v43  ;;  %3616 = vmatprep.subr.bf16.mxu0 %v4985_v44  ;;  %v5043_v43 = vld [vmem:[%s6747_s3 + $0x908] ss:$28 sps:$4 sm:$0xff]  }
 0x1e6   :  { %3657 = vmatprep.subr.bf16.mxu1 %v4988_v45  ;;  %v5046_v44 = vld [vmem:[%s6747_s3 + $0xc88] ss:$28 sps:$4 sm:$0xff]   ;;  %v5051_v45 = vld [vmem:[%s6747_s3 + $0x8d4] ss:$28 sps:$4 sm:$0xff]  }
 0x1e8   :  { %3617 = vmatpush1.bf16.msra.mxu0 %v4983_v46  ;;  %v5054_v46 = vld [vmem:[%s6747_s3 + $0xc54] ss:$28 sps:$4 sm:$0xff]  }
 0x1e9   :  { %3658 = vmatpush1.bf16.msra.mxu1 %v4986_v48  ;;  %3618 = vmatprep.subr.bf16.mxu0 %v4991_v50  ;;  %v5049_v48 = vld [vmem:[%s6747_s3 + $0x8d0] ss:$28 sps:$4 sm:$0xff]  }
 0x1ea   :  { %3659 = vmatprep.subr.bf16.mxu1 %v4994_v51  ;;  %v5052_v50 = vld [vmem:[%s6747_s3 + $0xc50] ss:$28 sps:$4 sm:$0xff]   ;;  %v5055_v51 = vld [vmem:[%s6747_s3 + $0x360] ss:$28 sps:$4 sm:$0xff]  }
 0x1eb   :  { %v5120_v58 = vpop.eup %5119 }
 0x1ec   :  { %v3871_v59 = vadd.f32 1.0, %v5120_v58  ;;  %3619 = vmatpush1.bf16.msra.mxu0 %v4989_v52  ;;  %v5056_v52 = vld [vmem:[%s6747_s3 + $0x6e0] ss:$28 sps:$4 sm:$0xff]  }
 0x1ed   :  { %v5122_v61 = vpop.eup %5121  ;;  %3660 = vmatpush1.bf16.msra.mxu1 %v4992_v55  ;;  %3620 = vmatprep.subr.bf16.mxu0 %v4997_v56  ;;  %v5057_v55 = vld [vmem:[%s6747_s3 + $0x1a0] ss:$28 sps:$4 sm:$0xff]  }
 0x1ee   :  { %5123 = vrcp.f32 %v3871_v59  ;;  %v3872_v63 = vadd.f32 1.0, %v5122_v61  ;;  %3661 = vmatprep.subr.bf16.mxu1 %v5000_v57  ;;  %v5058_v56 = vld [vmem:[%s6747_s3 + $0x520] ss:$28 sps:$4 sm:$0xff]   ;;  %v5059_v57 = vld [vmem:[%s6747_s3 + $0x328] ss:$28 sps:$4 sm:$0xff]  }
 0x1ef   :  { %v5060_v59 = vld [vmem:[%s6747_s3 + $0x6a8] ss:$28 sps:$4 sm:$0xff]  }
 0x1f0   :  { %5125 = vrcp.f32 %v3872_v63  ;;  %3621 = vmatpush1.bf16.msra.mxu0 %v4995_v60  ;;  %v5061_v61 = vld [vmem:[%s6747_s3 + $0x168] ss:$28 sps:$4 sm:$0xff]   ;;  %v5063_v63 = vld [vmem:[%s6747_s3 + $0x2f0] ss:$28 sps:$4 sm:$0xff]  }
 0x1f1   :  { %3662 = vmatpush1.bf16.msra.mxu1 %v4998_v39  ;;  %3622 = vmatprep.subr.bf16.mxu0 %v5003_v62  ;;  %v5062_v62 = vld [vmem:[%s6747_s3 + $0x4e8] ss:$28 sps:$4 sm:$0xff]  }
 0x1f2   :  { %3663 = vmatprep.subr.bf16.mxu1 %v5006_v41 }
 0x1f4   :  { %3623 = vmatpush1.bf16.msra.mxu0 %v5001_v0 }
 0x1f5   :  { %3664 = vmatpush1.bf16.msra.mxu1 %v5004_v1  ;;  %3624 = vmatprep.subr.bf16.mxu0 %v5009_v2  ;;  %v5065_v2 = vld [vmem:[%s6747_s3 + $0x130] ss:$28 sps:$4 sm:$0xff]  }
 0x1f6   :  { %3665 = vmatprep.subr.bf16.mxu1 %v5012_v30 }
 0x1f8   :  { %3625 = vmatpush2.bf16.msra.mxu0 %v5007_v5  ;;  %v5067_v5 = vld [vmem:[%s6747_s3 + $0x2b8] ss:$28 sps:$4 sm:$0xff]  }
 0x1f9   :  { %3666 = vmatpush2.bf16.msra.mxu1 %v5010_v6  ;;  %3626 = vmatprep.subr.bf16.mxu0 %v5015_v34  ;;  %v5068_v34 = vld [vmem:[%s6747_s3 + $0x638] ss:$28 sps:$4 sm:$0xff]  }
 0x1fa   :  { %3667 = vmatprep.subr.bf16.mxu1 %v5018_v7  ;;  %v5069_v7 = vld [vmem:[%s6747_s3 + $0xf8] ss:$28 sps:$4 sm:$0xff]  }
 0x1fb   :  { %v5124_v15 = vpop.eup %5123 }
 0x1fc   :  { %3892 = vst [vmem:[#allocation2] sm:$0xff] %v5124_v15  ;;  %3627 = vmatpush2.bf16.msra.mxu0 %v5013_v11  ;;  %v5070_v11 = vld [vmem:[%s6747_s3 + $0x478] ss:$28 sps:$4 sm:$0xff]   ;;  %v5074_v15 = vld [vmem:[%s6747_s3 + $0x440] ss:$28 sps:$4 sm:$0xff]  }
 0x1fd   :  { %v5126_v16 = vpop.eup %5125  ;;  %3668 = vmatpush2.bf16.msra.mxu1 %v5016_v13  ;;  %3628 = vmatprep.subr.bf16.mxu0 %v5021_v38  ;;  %v5071_v13 = vld [vmem:[%s6747_s3 + $0x280] ss:$28 sps:$4 sm:$0xff]  }
 0x1fe   :  { %3893 = vst [vmem:[#allocation2 + $0x8] sm:$0xff] %v5126_v16  ;;  %3669 = vmatprep.subr.bf16.mxu1 %v5024_v14  ;;  %v5072_v38 = vld [vmem:[%s6747_s3 + $0x600] ss:$28 sps:$4 sm:$0xff]   ;;  %v5076_v16 = vld [vmem:[%s6747_s3 + $0x5c8] ss:$28 sps:$4 sm:$0xff]  }
 0x1ff   :  { %v5073_v14 = vld [vmem:[%s6747_s3 + $0xc0] ss:$28 sps:$4 sm:$0xff]  }
 0x200   :  { %3629 = vmatpush2.bf16.msra.mxu0 %v5019_v36  ;;  %v5075_v36 = vld [vmem:[%s6747_s3 + $0x248] ss:$28 sps:$4 sm:$0xff]  }
 0x201   :  { %3670 = vmatpush2.bf16.msra.mxu1 %v5022_v17  ;;  %3630 = vmatprep.subr.bf16.mxu0 %v5027_v18  ;;  %v5077_v17 = vld [vmem:[%s6747_s3 + $0x88] ss:$28 sps:$4 sm:$0xff]  }
 0x202   :  { %3671 = vmatprep.subr.bf16.mxu1 %v5030_v20  ;;  %v5078_v18 = vld [vmem:[%s6747_s3 + $0x408] ss:$28 sps:$4 sm:$0xff]   ;;  %v5079_v20 = vld [vmem:[%s6747_s3 + $0x210] ss:$28 sps:$4 sm:$0xff]  }
 0x204   :  { %3631 = vmatpush2.bf16.msra.mxu0 %v5025_v22  ;;  %v5080_v22 = vld [vmem:[%s6747_s3 + $0x590] ss:$28 sps:$4 sm:$0xff]  }
 0x205   :  { %3672 = vmatpush2.bf16.msra.mxu1 %v5028_v23  ;;  %3632 = vmatprep.subr.bf16.mxu0 %v5033_v24  ;;  %v5081_v23 = vld [vmem:[%s6747_s3 + $0x50] ss:$28 sps:$4 sm:$0xff]  }
 0x206   :  { %3673 = vmatprep.subr.bf16.mxu1 %v5036_v25  ;;  %v5082_v24 = vld [vmem:[%s6747_s3 + $0x3d0] ss:$28 sps:$4 sm:$0xff]   ;;  %v5083_v25 = vld [vmem:[%s6747_s3 + $0x1d8] ss:$28 sps:$4 sm:$0xff]  }
 0x208   :  { %3633 = vmatpush2.bf16.msra.mxu0 %v5031_v26  ;;  %v5084_v26 = vld [vmem:[%s6747_s3 + $0x558] ss:$28 sps:$4 sm:$0xff]  }
 0x209   :  { %3674 = vmatpush2.bf16.msra.mxu1 %v5034_v28  ;;  %3634 = vmatprep.subr.bf16.mxu0 %v5039_v29  ;;  %v5085_v28 = vld [vmem:[%s6747_s3 + $0x18] ss:$28 sps:$4 sm:$0xff]  }
 0x20a   :  { %3675 = vmatprep.subr.bf16.mxu1 %v5042_v32  ;;  %v5086_v29 = vld [vmem:[%s6747_s3 + $0x398] ss:$28 sps:$4 sm:$0xff]   ;;  %v5087_v32 = vld [vmem:[%s6747_s3 + $0xa60] ss:$28 sps:$4 sm:$0xff]  }
 0x20c   :  { %3635 = vmatpush2.bf16.msra.mxu0 %v5037_v33  ;;  %v5088_v33 = vld [vmem:[%s6747_s3 + $0xde0] ss:$28 sps:$4 sm:$0xff]  }
 0x20d   :  { %3676 = vmatpush2.bf16.msra.mxu1 %v5040_v35  ;;  %3636 = vmatprep.subr.bf16.mxu0 %v5045_v12  ;;  %v5089_v35 = vld [vmem:[%s6747_s3 + $0x8a0] ss:$28 sps:$4 sm:$0xff]  }
 0x20e   :  { %3677 = vmatprep.subr.bf16.mxu1 %v5048_v10  ;;  %v5090_v12 = vld [vmem:[%s6747_s3 + $0xc20] ss:$28 sps:$4 sm:$0xff]   ;;  %v5091_v10 = vld [vmem:[%s6747_s3 + $0xa28] ss:$28 sps:$4 sm:$0xff]  }
 0x210   :  { %3637 = vmatpush2.bf16.msra.mxu0 %v5043_v43  ;;  %v5092_v43 = vld [vmem:[%s6747_s3 + $0xda8] ss:$28 sps:$4 sm:$0xff]  }
 0x211   :  { %3678 = vmatpush2.bf16.msra.mxu1 %v5046_v44  ;;  %3638 = vmatprep.subr.bf16.mxu0 %v5051_v45  ;;  %v5093_v44 = vld [vmem:[%s6747_s3 + $0x868] ss:$28 sps:$4 sm:$0xff]  }
 0x212   :  { %3679 = vmatprep.subr.bf16.mxu1 %v5054_v46  ;;  %v5094_v45 = vld [vmem:[%s6747_s3 + $0xbe8] ss:$28 sps:$4 sm:$0xff]   ;;  %v5098_v46 = vld [vmem:[%s6747_s3 + $0xbb0] ss:$28 sps:$4 sm:$0xff]  }
 0x214   :  { %3639 = vmatpush2.bf16.msra.mxu0 %v5049_v48  ;;  %v5100_v48 = vld [vmem:[%s6747_s3 + $0xd38] ss:$28 sps:$4 sm:$0xff]  }
 0x215   :  { %3680 = vmatpush2.bf16.msra.mxu1 %v5052_v50  ;;  %4389 = vmatprep.subr.bf16.mxu0 %v5055_v51  ;;  %v5101_v50 = vld [vmem:[%s6747_s3 + $0x7f8] ss:$28 sps:$4 sm:$0xff]  }
 0x216   :  { %4411 = vmatprep.subr.bf16.mxu1 %v5056_v52  ;;  %v5102_v51 = vld [vmem:[%s6747_s3 + $0xb78] ss:$28 sps:$4 sm:$0xff]   ;;  %v5103_v52 = vld [vmem:[%s6747_s3 + $0x980] ss:$28 sps:$4 sm:$0xff]  }
 0x217   :  { %v6527_v58 = vpop.f32.mrf.mxu0  ;;  %3641 = vmatmul.mubr.bf16.vlgmr.msra.gmra.mxu0 %v5712_v49 }
 0x218   :  { %v6533_v60 = vpop.f32.mrf.mxu1  ;;  %3682 = vmatmul.mubr.bf16.vlgmr.msra.gmra.mxu1 %v5707_v47  ;;  %4390 = vmatpush3.bf16.msra.mxu0 %v5057_v55  ;;  %v5104_v55 = vld [vmem:[%s6747_s3 + $0xd00] ss:$28 sps:$4 sm:$0xff]  }
 0x219   :  { %3722 = vmatprep.mubr.bf16.mxu0 %v5490_v4  ;;  %4412 = vmatpush3.bf16.msra.mxu1 %v5058_v56  ;;  %v6540_v39 = vpop.f32.mrf.mxu0  ;;  %v5064_v4 = vld [vmem:[%s6747_s3 + $0x670] ss:$28 sps:$4 sm:$0xff]   ;;  %v5105_v56 = vld [vmem:[%s6747_s3 + $0x7c0] ss:$28 sps:$4 sm:$0xff]  }
 0x21a   :  { %3762 = vmatprep.mubr.bf16.mxu1 %v5500_v9  ;;  %v6549_v41 = vpop.f32.mrf.mxu1  ;;  %4391 = vmatprep.subr.bf16.mxu0 %v5059_v57  ;;  %v5066_v9 = vld [vmem:[%s6747_s3 + $0x4b0] ss:$28 sps:$4 sm:$0xff]   ;;  %v5106_v57 = vld [vmem:[%s6747_s3 + $0xb40] ss:$28 sps:$4 sm:$0xff]  }
 0x21b   :  { %v3400_v0 = vpop.f32.mrf.mxu0  ;;  %4413 = vmatprep.subr.bf16.mxu1 %v5060_v59  ;;  %v5107_v59 = vld [vmem:[%s6747_s3 + $0x948] ss:$28 sps:$4 sm:$0xff]  }
 0x21c   :  { %v3441_v1 = vpop.f32.mrf.mxu1  ;;  %4392 = vmatpush3.bf16.msra.mxu0 %v5061_v61  ;;  %v5108_v61 = vld [vmem:[%s6747_s3 + $0xcc8] ss:$28 sps:$4 sm:$0xff]   ;;  %v5112_v0 = vld [vmem:[%s6747_s3 + $0xc90] ss:$28 sps:$4 sm:$0xff]  }
 0x21d   :  { %4414 = vmatpush3.bf16.msra.mxu1 %v5062_v62  ;;  %v3401_v30 = vpop.f32.mrf.mxu0  ;;  %4393 = vmatprep.subr.bf16.mxu0 %v5063_v63  ;;  %v5109_v62 = vld [vmem:[%s6747_s3 + $0x788] ss:$28 sps:$4 sm:$0xff]   ;;  %v5113_v1 = vld [vmem:[%s6747_s3 + $0x750] ss:$28 sps:$4 sm:$0xff]  }
 0x21e   :  { %v3442_v6 = vpop.f32.mrf.mxu1  ;;  %4415 = vmatprep.subr.bf16.mxu1 %v5064_v4  ;;  %v5110_v63 = vld [vmem:[%s6747_s3 + $0xb08] ss:$28 sps:$4 sm:$0xff]   ;;  %v5111_v4 = vld [vmem:[%s6747_s3 + $0x910] ss:$28 sps:$4 sm:$0xff]   ;;  %v5115_v30 = vld [vmem:[%s6747_s3 + $0x8d8] ss:$28 sps:$4 sm:$0xff]  }
 0x21f   :  { %v874_v6 = vrot.slane %v6286_v53, %v55_v42 }
 0x220   :  { %4394 = vmatpush3.bf16.msra.mxu0 %v5065_v2  ;;  %v5114_v2 = vld [vmem:[%s6747_s3 + $0xad0] ss:$28 sps:$4 sm:$0xff]  }
 0x221   :  { %4416 = vmatpush3.bf16.msra.mxu1 %v5066_v9  ;;  %4395 = vmatprep.subr.bf16.mxu0 %v5067_v5  ;;  %v870_v9 = vrot.slane %v6286_v53, %v51_v40  ;;  %v5116_v5 = vld [vmem:[%s6747_s3 + $0xc58] ss:$28 sps:$4 sm:$0xff]  }
 0x222   :  { %4417 = vmatprep.subr.bf16.mxu1 %v5068_v34  ;;  %v5117_v34 = vld [vmem:[%s6747_s3 + $0x718] ss:$28 sps:$4 sm:$0xff]  }
 0x223   :  { %v5118_v40 = vld [vmem:[%s6747_s3 + $0xa98] ss:$28 sps:$4 sm:$0xff]  }
 0x224   :  { %4396 = vmatpush3.bf16.msra.mxu0 %v5069_v7  ;;  %v3397_v7 = vadd.f32 %v6527_v58, %v870_v9 }
 0x225   :  { %4418 = vmatpush3.bf16.msra.mxu1 %v5070_v11  ;;  %4397 = vmatprep.subr.bf16.mxu0 %v5071_v13  ;;  %v3399_v11 = vadd.f32 %v6540_v39, %v874_v6 }
 0x226   :  { %4419 = vmatprep.subr.bf16.mxu1 %v5072_v38  ;;  %v3438_v42 = vadd.f32 %v6533_v60, %v3397_v7 }
 0x227   :  { %v3440_v38 = vadd.f32 %v6549_v41, %v3399_v11 }
 0x228   :  { %4398 = vmatpush3.bf16.msra.mxu0 %v5073_v14 }
 0x229   :  { %4420 = vmatpush3.bf16.msra.mxu1 %v5074_v15  ;;  %4399 = vmatprep.subr.bf16.mxu0 %v5075_v36 }
 0x22a   :  { %4421 = vmatprep.subr.bf16.mxu1 %v5076_v16 }
 0x22c   :  { %4400 = vmatpush3.bf16.msra.mxu0 %v5077_v17 }
 0x22d   :  { %4422 = vmatpush3.bf16.msra.mxu1 %v5078_v18  ;;  %4401 = vmatprep.subr.bf16.mxu0 %v5079_v20 }
 0x22e   :  { %4423 = vmatprep.subr.bf16.mxu1 %v5080_v22 }
 0x230   :  { %4402 = vmatpush3.bf16.msra.mxu0 %v5081_v23 }
 0x231   :  { %4424 = vmatpush3.bf16.msra.mxu1 %v5082_v24  ;;  %4403 = vmatprep.subr.bf16.mxu0 %v5083_v25 }
 0x232   :  { %4425 = vmatprep.subr.bf16.mxu1 %v5084_v26 }
 0x234   :  { %4404 = vmatpush3.bf16.msra.mxu0 %v5085_v28 }
 0x235   :  { %4426 = vmatpush3.bf16.msra.mxu1 %v5086_v29  ;;  %4433 = vmatprep.subr.bf16.mxu0 %v5087_v32 }
 0x236   :  { %4455 = vmatprep.subr.bf16.mxu1 %v5088_v33 }
 0x237   :  { %3723 = vmatmul.mubr.bf16.vlgmr.msra.gmra.mxu0 %v5498_v8  ;;  %v5095_v8 = vld [vmem:[%s6747_s3 + $0x9f0] ss:$28 sps:$4 sm:$0xff]  }
 0x238   :  { %3763 = vmatmul.mubr.bf16.vlgmr.msra.gmra.mxu1 %v5488_v3  ;;  %4434 = vmatpush3.bf16.msra.mxu0 %v5089_v35  ;;  %v5096_v3 = vld [vmem:[%s6747_s3 + $0xd70] ss:$28 sps:$4 sm:$0xff]  }
 0x239   :  { %3802 = vmatprep.mubr.bf16.mxu0 %v5526_v27  ;;  %4456 = vmatpush3.bf16.msra.mxu1 %v5090_v12  ;;  %v5097_v27 = vld [vmem:[%s6747_s3 + $0x830] ss:$28 sps:$4 sm:$0xff]  }
 0x23a   :  { %3842 = vmatprep.mubr.bf16.mxu1 %v5534_v31  ;;  %4435 = vmatprep.subr.bf16.mxu0 %v5091_v10  ;;  %v5099_v31 = vld [vmem:[%s6747_s3 + $0x9b8] ss:$28 sps:$4 sm:$0xff]   ;;  %s5170_s3 = smov [#allocation2]  }
 0x23b   :  { %4457 = vmatprep.subr.bf16.mxu1 %v5092_v43  ;;  %s3906_s2 = sshll.u32 %s5170_s3, 4  ;;  %s3907_s2 = int_to_ptr.vmem [resolvable:$true] %s3906_s2 }
 0x23c   :  { %4436 = vmatpush3.bf16.msra.mxu0 %v5093_v44  ;;  %s5147_s26 = scalar_lea.vmem %s3907_s2, 896  ;;  %p5152_p1 = scmp.lt.s32.totalorder %s3907_s2, %s3907_s2 }
 0x23d   :  { %4458 = vmatpush3.bf16.msra.mxu1 %v5094_v45  ;;  %4437 = vmatprep.subr.bf16.mxu0 %v5095_v8  ;;  %v878_v45 = vrot.slane %v6286_v53, %v59_v21  ;;  %v882_v8 = vrot.slane %v6286_v53, %v63_v54  ;;  %p5148_p0 = scmp.ne.s32.totalorder %s3907_s2, %s5147_s26  ;;  %p5153_p2 = scmp.lt.s32.totalorder %s5147_s26, %s5147_s26 }
 0x23e   :  { %4459 = vmatprep.subr.bf16.mxu1 %v5096_v3 }
 0x23f   :  { %p5154_p3 = por %p5153_p2, %p5152_p1 }
 0x240   :  { %4438 = vmatpush3.bf16.msra.mxu0 %v5097_v27 }
 0x241   :  { %4460 = vmatpush3.bf16.msra.mxu1 %v5098_v46  ;;  %4439 = vmatprep.subr.bf16.mxu0 %v5099_v31  ;;  %p5155_p4 = pnand %p5154_p3, %p5148_p0 }
 0x242   :  { %4461 = vmatprep.subr.bf16.mxu1 %v5100_v48 }
 0x244   :  { %4440 = vmatpush3.bf16.msra.mxu0 %v5101_v50 }
 0x245   :  { %4462 = vmatpush3.bf16.msra.mxu1 %v5102_v51  ;;  %4441 = vmatprep.subr.bf16.mxu0 %v5103_v52 }
 0x246   :  { %4463 = vmatprep.subr.bf16.mxu1 %v5104_v55 }
 0x248   :  { %4442 = vmatpush3.bf16.msra.mxu0 %v5105_v56 }
 0x249   :  { %4464 = vmatpush3.bf16.msra.mxu1 %v5106_v57  ;;  %4443 = vmatprep.subr.bf16.mxu0 %v5107_v59 }
 0x24a   :  { %4465 = vmatprep.subr.bf16.mxu1 %v5108_v61 }
 0x24c   :  { %4444 = vmatpush3.bf16.msra.mxu0 %v5109_v62 }
 0x24d   :  { %4466 = vmatpush3.bf16.msra.mxu1 %v5110_v63  ;;  %4445 = vmatprep.subr.bf16.mxu0 %v5111_v4 }
 0x24e   :  { %4467 = vmatprep.subr.bf16.mxu1 %v5112_v0 }
 0x250   :  { %4446 = vmatpush3.bf16.msra.mxu0 %v5113_v1 }
 0x251   :  { %4468 = vmatpush3.bf16.msra.mxu1 %v5114_v2  ;;  %4447 = vmatprep.subr.bf16.mxu0 %v5115_v30 }
 0x252   :  { %4469 = vmatprep.subr.bf16.mxu1 %v5116_v5 }
 0x254   :  { %4448 = vmatpush3.bf16.msra.mxu0 %v5117_v34 }
 0x255   :  { %4470 = vmatpush3.bf16.msra.mxu1 %v5118_v40 }
 0x257   :  { %v3478_v13 = vpop.f32.mrf.mxu0  ;;  %3803 = vmatmul.mubr.bf16.vlgmr.msra.gmra.mxu0 %v5712_v49 }
 0x258   :  { %v3479_v14 = vadd.f32 %v3478_v13, %v3438_v42  ;;  %v3519_v15 = vpop.f32.mrf.mxu1  ;;  %3843 = vmatmul.mubr.bf16.vlgmr.msra.gmra.mxu1 %v5707_v47 }
 0x259   :  { %v3480_v36 = vpop.f32.mrf.mxu0 }
 0x25a   :  { %v3520_v16 = vadd.f32 %v3519_v15, %v3479_v14  ;;  %v3481_v17 = vadd.f32 %v3480_v36, %v3440_v38  ;;  %v3521_v58 = vpop.f32.mrf.mxu1  ;;  %v886_v14 = vrot.slane %v6286_v53, %v67_v19 }
 0x25b   :  { %v3482_v18 = vpop.f32.mrf.mxu0 }
 0x25c   :  { %v4384_v20 = vmul.f32 -1.442695, %v3520_v16  ;;  %v3522_v39 = vadd.f32 %v3521_v58, %v3481_v17  ;;  %v3523_v22 = vpop.f32.mrf.mxu1 }
 0x25d   :  { %v3483_v23 = vpop.f32.mrf.mxu0 }
 0x25e   :  { %5127 = vpow2.f32 %v4384_v20  ;;  %v4385_v60 = vmul.f32 -1.442695, %v3522_v39  ;;  %v3524_v24 = vpop.f32.mrf.mxu1 }
 0x260   :  { %5129 = vpow2.f32 %v4385_v60 }
 0x26b   :  { %v5128_v49 = vpop.eup %5127 }
 0x26c   :  { %v3873_v25 = vadd.f32 1.0, %v5128_v49 }
 0x26d   :  { %v5130_v41 = vpop.eup %5129 }
 0x26e   :  { %5131 = vrcp.f32 %v3873_v25  ;;  %v3874_v26 = vadd.f32 1.0, %v5130_v41 }
 0x270   :  { %5133 = vrcp.f32 %v3874_v26 }
 0x27b   :  { %v5132_v47 = vpop.eup %5131 }
 0x27c   :  { %3894 = vst [vmem:[#allocation2 + $0x10] sm:$0xff] %v5132_v47 }
 0x27d   :  { %v5134_v28 = vpop.eup %5133 }
 0x27e   :  { %3895 = vst [vmem:[#allocation2 + $0x18] sm:$0xff] %v5134_v28 }
 0x297   :  { %v3560_v29 = vpop.f32.mrf.mxu0 }
 0x298   :  { %v3601_v32 = vpop.f32.mrf.mxu1  ;;  %v3561_v3 = vadd.f32 %v3560_v29, %v878_v45 }
 0x299   :  { %v3562_v33 = vpop.f32.mrf.mxu0 }
 0x29a   :  { %v3603_v35 = vpop.f32.mrf.mxu1  ;;  %v3563_v27 = vadd.f32 %v3562_v33, %v882_v8  ;;  %v3602_v46 = vadd.f32 %v3601_v32, %v3561_v3 }
 0x29b   :  { %v3564_v12 = vpop.f32.mrf.mxu0 }
 0x29c   :  { %v3605_v10 = vpop.f32.mrf.mxu1  ;;  %v3604_v48 = vadd.f32 %v3603_v35, %v3563_v27 }
 0x29d   :  { %v3565_v43 = vpop.f32.mrf.mxu0 }
 0x29e   :  { %v3606_v44 = vpop.f32.mrf.mxu1 }
 0x2d7   :  { %v3642_v31 = vpop.f32.mrf.mxu0 }
 0x2d8   :  { %v3643_v50 = vadd.f32 %v3642_v31, %v3602_v46  ;;  %v3683_v51 = vpop.f32.mrf.mxu1 }
 0x2d9   :  { %v3644_v52 = vpop.f32.mrf.mxu0 }
 0x2da   :  { %v3684_v55 = vadd.f32 %v3683_v51, %v3643_v50  ;;  %v3645_v56 = vadd.f32 %v3644_v52, %v3604_v48  ;;  %v3685_v57 = vpop.f32.mrf.mxu1 }
 0x2db   :  { %v3646_v59 = vpop.f32.mrf.mxu0 }
 0x2dc   :  { %v4386_v61 = vmul.f32 -1.442695, %v3684_v55  ;;  %v3686_v62 = vadd.f32 %v3685_v57, %v3645_v56  ;;  %v3687_v63 = vpop.f32.mrf.mxu1 }
 0x2dd   :  { %v3647_v21 = vpop.f32.mrf.mxu0 }
 0x2de   :  { %5135 = vpow2.f32 %v4386_v61  ;;  %v4387_v4 = vmul.f32 -1.442695, %v3686_v62  ;;  %v3688_v0 = vpop.f32.mrf.mxu1 }
 0x2e0   :  { %5137 = vpow2.f32 %v4387_v4 }
 0x2eb   :  { %v5136_v54 = vpop.eup %5135 }
 0x2ec   :  { %v3875_v1 = vadd.f32 1.0, %v5136_v54 }
 0x2ed   :  { %v5138_v2 = vpop.eup %5137 }
 0x2ee   :  { %5139 = vrcp.f32 %v3875_v1  ;;  %v3876_v30 = vadd.f32 1.0, %v5138_v2 }
 0x2f0   :  { %5141 = vrcp.f32 %v3876_v30 }
 0x2f7   :  { %v4405_v9 = vpop.f32.mrf.mxu0 }
 0x2f8   :  { %v4427_v5 = vpop.f32.mrf.mxu1 }
 0x2f9   :  { %v4406_v6 = vpop.f32.mrf.mxu0 }
 0x2fa   :  { %v4428_v34 = vpop.f32.mrf.mxu1  ;;  %v4407_v15 = vadd.f32 %v4406_v6, %v4405_v9 }
 0x2fb   :  { %v5140_v40 = vpop.eup %5139  ;;  %v4408_v7 = vpop.f32.mrf.mxu0  ;;  %v4429_v17 = vadd.f32 %v4428_v34, %v4427_v5 }
 0x2fc   :  { %3896 = vst [vmem:[#allocation2 + $0x20] sm:$0xff] %v5140_v40  ;;  %v4430_v11 = vpop.f32.mrf.mxu1  ;;  %v3725_v36 = vadd.f32 %v4407_v15, %v886_v14 }
 0x2fd   :  { %v5142_v42 = vpop.eup %5141  ;;  %v4409_v13 = vpop.f32.mrf.mxu0 }
 0x2fe   :  { %3897 = vst [vmem:[#allocation2 + $0x28] sm:$0xff] %v5142_v42  ;;  %v4431_v38 = vpop.f32.mrf.mxu1  ;;  %v3765_v20 = vadd.f32 %v4429_v17, %v3725_v36 }
 0x317   :  { %v4449_v16 = vpop.f32.mrf.mxu0 }
 0x318   :  { %v4471_v58 = vpop.f32.mrf.mxu1 }
 0x319   :  { %v4450_v18 = vpop.f32.mrf.mxu0 }
 0x31a   :  { %v4451_v39 = vadd.f32 %v4450_v18, %v4449_v16  ;;  %v4472_v22 = vpop.f32.mrf.mxu1 }
 0x31b   :  { %v4452_v23 = vpop.f32.mrf.mxu0  ;;  %v4473_v24 = vadd.f32 %v4472_v22, %v4471_v58 }
 0x31c   :  { %v3805_v60 = vadd.f32 %v4451_v39, %v3765_v20  ;;  %v4474_v49 = vpop.f32.mrf.mxu1 }
 0x31d   :  { %v4453_v25 = vpop.f32.mrf.mxu0 }
 0x31e   :  { %v3845_v41 = vadd.f32 %v4473_v24, %v3805_v60  ;;  %v4475_v26 = vpop.f32.mrf.mxu1 }
 0x320   :  { %v4388_v47 = vmul.f32 -1.442695, %v3845_v41 }
 0x322   :  { %5143 = vpow2.f32 %v4388_v47 }
 0x32f   :  { %v5144_v37 = vpop.eup %5143 }
 0x330   :  { %v3877_v19 = vadd.f32 1.0, %v5144_v37 }
 0x332   :  { %5145 = vrcp.f32 %v3877_v19 }
 0x33f   :  { %v5146_v53 = vpop.eup %5145 }
 0x340   :  { %3899 = vst.msk [vmem:[#allocation2 + $0x30] sm:$0xff] %vm3898_vm1, %v5146_v53 }
 0x341   :  { %5158 = shalt.err (!%p5155_p4)
}
 0x342   :  { %3909 = dma.vmem_to_hbm [thread:$0]  %s3907_s2, 896, %s6749_s5, [#allocation3]  }
 0x343   :  { %5167 = dma.done.wait [#allocation3], 896  }
 0x344   :  { %5168 = vsyncadd [#allocation3], 4294966400 }
 0x345   :  { %3913 = vsyncpa [#allocation3], 1 }

</bundles_post_ra>
